<compile_context>
chip_gen: v7x
topology: tpu7x:2x2x1
jax: 0.10.0
libtpu: 0.0.40
codegen_flags: <defaults>
</compile_context>

<pallas_src>
import functools

import jax
import jax.numpy as jnp
from jax.experimental import pallas as pl
from jax.experimental.pallas import tpu as pltpu


def _lconv_kernel(x_ref, wact_ref, bact_ref, wc_ref, wfc1_ref, bfc1_ref,
                  wfc2_ref, bfc2_ref, gamma_ref, beta_ref, o_ref,
                  *, c_real, t_real, kernel_size, padding_l, hidden_chunk, eps,
                  compute_dtype):
    Bb, Tp, Cp = x_ref.shape
    K, P = kernel_size, padding_l
    rows = Bb * Tp
    H4 = wfc1_ref.shape[1]
    Hc = hidden_chunk

    x = x_ref[...].astype(jnp.float32)                 # (Bb, Tp, Cp) residual, f32
    x2d = x.reshape(rows, Cp)                          # Tp % 8 == 0 -> free view

    # ---- act_linear (C -> 2C, bias) + GLU; MXU sees M = rows ----
    h = jnp.dot(x2d.astype(compute_dtype), wact_ref[...],
                preferred_element_type=jnp.float32) + bact_ref[...]
    y = h[:, :Cp] * jax.nn.sigmoid(h[:, Cp:])          # (rows, Cp) f32

    # ---- LightweightConv via XLU sublane rolls + boundary masks (no zero slabs) ----
    # out[b, t, c] = sum_k w[k, c] * y[b, t - P + k, c], zero outside [0, t_real).
    wc = wc_ref[...]                                   # (K, Cp) f32, loaded once
    t_pos = jax.lax.broadcasted_iota(jnp.int32, (Bb, Tp, 1), 1)
    y3 = y.reshape(Bb, Tp, Cp)
    conv = wc[P][None, None, :] * y3                   # s == 0 tap (never masked)
    for k in range(K):                                 # K is small & static
        s = k - P
        if s == 0:
            continue
        rolled = pltpu.roll(y, (-s) % rows, axis=0).reshape(Bb, Tp, Cp)
        valid = (t_pos + s >= 0) & (t_pos + s < t_real)
        conv = conv + wc[k][None, None, :] * jnp.where(valid, rolled, 0.0)

    x2 = (x + conv).reshape(rows, Cp)                  # residual 1 (f32)

    # ---- position-wise FFN: relu(fc1) -> fc2, tiled along the 4C hidden dim ----
    x2c = x2.astype(compute_dtype)                     # cast once, reuse per chunk
    h2 = jnp.zeros((rows, Cp), jnp.float32)
    for j in range(H4 // Hc):                          # static, small chunk count
        lo, hi = j * Hc, (j + 1) * Hc
        h1 = jnp.maximum(
            jnp.dot(x2c, wfc1_ref[:, lo:hi],
                    preferred_element_type=jnp.float32) + bfc1_ref[:, lo:hi], 0.0)
        h2 = h2 + jnp.dot(h1.astype(compute_dtype), wfc2_ref[lo:hi, :],
                          preferred_element_type=jnp.float32)
    x3 = x2 + h2 + bfc2_ref[...]                       # residual 2 (f32)

    # ---- LayerNorm over the REAL channel count (centered two-pass variance).
    # Padded channel lanes of x3 are exactly 0, so the sum equals the real sum;
    # the variance masks the padded lanes (where diff == -mean, not 0).
    inv_c = 1.0 / float(c_real)
    mean = jnp.sum(x3, axis=-1, keepdims=True) * inv_c
    diff = x3 - mean
    if Cp != c_real:
        lane = jax.lax.broadcasted_iota(jnp.int32, (1, Cp), 1)
        diff_sq = jnp.where(lane < c_real, diff, 0.0)
    else:
        diff_sq = diff
    var = jnp.sum(diff_sq * diff_sq, axis=-1, keepdims=True) * inv_c
    out = diff * jax.lax.rsqrt(var + eps) * gamma_ref[...] + beta_ref[...]
    o_ref[...] = out.reshape(Bb, Tp, Cp).astype(o_ref.dtype)


def _round_up(v, m):
    return -(-v // m) * m


def _pad_to(a, shape):
    return jnp.pad(a, [(0, s - d) for d, s in zip(a.shape, shape)])


def lconv_block(x, p, *, kernel_size, num_heads, eps=1e-5,
                compute_dtype=jnp.bfloat16):
    B, T, C = x.shape
    K, H = kernel_size, num_heads
    R = C // H
    padding_l = K // 2 if K % 2 == 1 else (K - 1) // 2

    # ---- lane-dense channel/hidden padding + sublane-aligned time padding ----
    C_pad = _round_up(C, 128)
    H4 = _round_up(4 * C, 128)          # FFN hidden padded independently (no 4x waste)
    T_pad = _round_up(T, 8)
    Hc = min(H4, 512 if H4 % 512 == 0 else (256 if H4 % 256 == 0 else 128))

    # act_linear weight: keep the GLU split points at 0 / C_pad of the padded output.
    wa_t = p["w_act"].T                                      # (C, 2C)
    w_act_p = jnp.concatenate(
        [_pad_to(wa_t[:, :C], (C_pad, C_pad)),
         _pad_to(wa_t[:, C:], (C_pad, C_pad))], axis=1).astype(compute_dtype)
    b_act_p = jnp.concatenate(
        [_pad_to(p["b_act"][:C], (C_pad,)),
         _pad_to(p["b_act"][C:], (C_pad,))])[None, :]        # (1, 2*C_pad) f32

    # conv taps: softmaxed per-head weights expanded to per-channel (weight_softmax=True).
    wsm = jax.nn.softmax(p["conv_w"], axis=-1)               # (H, K)
    wc = _pad_to(jnp.repeat(wsm, R, axis=0).T, (K, C_pad))   # (K, C_pad) f32

    w_fc1_p = _pad_to(p["w_fc1"].T, (C_pad, H4)).astype(compute_dtype)
    b_fc1_p = _pad_to(p["b_fc1"], (H4,))[None, :]
    w_fc2_p = _pad_to(p["w_fc2"].T, (H4, C_pad)).astype(compute_dtype)
    b_fc2_p = _pad_to(p["b_fc2"], (C_pad,))[None, :]
    gamma_p = _pad_to(p["gamma"], (C_pad,))[None, :]
    beta_p = _pad_to(p["beta"], (C_pad,))[None, :]

    x_p = _pad_to(x, (B, T_pad, C_pad))

    # ---- generation-aware tile / VMEM sizing ----
    try:
        vmem_cap = int(pltpu.get_tpu_info().vmem_capacity_bytes)
    except Exception:
        vmem_cap = 64 << 20                                  # conservative (v7x per-TC)
    w_item = jnp.dtype(compute_dtype).itemsize
    weight_bytes = (2 * C_pad * C_pad + 2 * C_pad * H4) * w_item   # single-buffered
    small_bytes = (K + 8) * C_pad * 4 + 2 * H4 * 4
    per_row_io = 2 * 2 * C_pad * x.dtype.itemsize            # in+out, double-buffered
    per_row_act = 4 * (12 * C_pad + 3 * Hc)                  # live f32 slabs (approx)
    per_row = per_row_io + int(1.3 * per_row_act)
    avail = int(0.80 * vmem_cap) - (weight_bytes + small_bytes)
    rows_fit = max(T_pad, avail // per_row)
    target_rows = 1024 if vmem_cap >= (96 << 20) else 512    # v5e/v6e vs v7x
    b_blk = max(1, min(B, target_rows // T_pad, rows_fit // T_pad))
    while B % b_blk:                                         # keep the grid even
        b_blk -= 1
    # TODO(synk): add an intra-sequence T-block grid axis (with a K-1 halo for the conv)
    # so very long sequences don't force the whole (T, C) activation set into one step.
    grid = (B // b_blk,)
    rows = b_blk * T_pad

    demand = weight_bytes + small_bytes + rows * per_row
    vmem_limit = int(min(max(vmem_cap - (8 << 20), 16 << 20),
                         max(demand, 16 << 20)))

    cost = pl.CostEstimate(
        flops=2 * B * T_pad * (2 * C_pad * C_pad + 2 * C_pad * H4)
              + 2 * B * T_pad * C_pad * K + 10 * B * T_pad * C_pad,
        transcendentals=B * T_pad * (2 * C_pad + 1),          # sigmoid (~2/elt) + rsqrt
        bytes_accessed=2 * B * T_pad * C_pad * x.dtype.itemsize
                       + weight_bytes + small_bytes)

    kernel = functools.partial(
        _lconv_kernel, c_real=C, t_real=T, kernel_size=K, padding_l=padding_l,
        hidden_chunk=Hc, eps=eps, compute_dtype=compute_dtype)

    args = (x_p, w_act_p, b_act_p, wc, w_fc1_p, b_fc1_p, w_fc2_p, b_fc2_p,
            gamma_p, beta_p)

    def build(single_buffer_weights):
        def inv(shape):
            # Grid-invariant operand (constant block index => DMA'd once, kept
            # resident); single pipeline buffer reclaims the second weight copy.
            n = len(shape)
            if single_buffer_weights:
                return pl.BlockSpec(shape, lambda b, _n=n: (0,) * _n,
                                    pipeline_mode=pl.Buffered(1))
            return pl.BlockSpec(shape, lambda b, _n=n: (0,) * _n)

        return pl.pallas_call(
            kernel,
            out_shape=jax.ShapeDtypeStruct((B, T_pad, C_pad), x.dtype),
            grid=grid,
            in_specs=[
                pl.BlockSpec((b_blk, T_pad, C_pad), lambda b: (b, 0, 0)),   # x
                inv((C_pad, 2 * C_pad)), inv((1, 2 * C_pad)),               # act_linear
                inv((K, C_pad)),                                            # conv taps
                inv((C_pad, H4)), inv((1, H4)),                             # fc1
                inv((H4, C_pad)), inv((1, C_pad)),                          # fc2
                inv((1, C_pad)), inv((1, C_pad)),                           # gamma/beta
            ],
            out_specs=pl.BlockSpec((b_blk, T_pad, C_pad), lambda b: (b, 0, 0)),
            compiler_params=pltpu.CompilerParams(
                dimension_semantics=("parallel",),     # batch blocks independent
                vmem_limit_bytes=vmem_limit),
            cost_estimate=cost,
        )

    try:
        out_p = build(True)(*args)
    except Exception:
        # Fallback in case this JAX build rejects pipeline_mode=pl.Buffered(1).
        out_p = build(False)(*args)

    return out_p[:, :T, :C]


def lconv_ref(x, p, *, kernel_size, num_heads, eps=1e-5):
    """Pure-JAX f32 reference mirroring the PyTorch forward (mask=None, eval)."""
    B, T, C = x.shape
    K, H = kernel_size, num_heads
    R = C // H
    P = K // 2 if K % 2 == 1 else (K - 1) // 2
    h = x @ p["w_act"].T + p["b_act"]
    y = h[..., :C] * jax.nn.sigmoid(h[..., C:])
    wsm = jax.nn.softmax(p["conv_w"], axis=-1)
    wc = jnp.repeat(wsm, R, axis=0).T                # (K, C)
    ypad = jnp.pad(y, ((0, 0), (P, K - 1 - P), (0, 0)))
    conv = sum(wc[k][None, None, :] * ypad[:, k:k + T, :] for k in range(K))
    x2 = x + conv
    h1 = jax.nn.relu(x2 @ p["w_fc1"].T + p["b_fc1"])
    h2 = h1 @ p["w_fc2"].T + p["b_fc2"]
    x3 = x2 + h2
    mean = x3.mean(-1, keepdims=True)
    var = ((x3 - mean) ** 2).mean(-1, keepdims=True)
    return (x3 - mean) * jax.lax.rsqrt(var + eps) * p["gamma"] + p["beta"]


def make_params(key, d_model, kernel_size, num_heads):
    C, K, H = d_model, kernel_size, num_heads
    ks = jax.random.split(key, 4)

    def xavier(k, fan_in, fan_out):  # torch nn.init.xavier_uniform_ on (out, in)
        bound = (6.0 / (fan_in + fan_out)) ** 0.5
        return jax.random.uniform(k, (fan_out, fan_in), jnp.float32, -bound, bound)

    return {
        "w_act": xavier(ks[0], C, 2 * C),            # (2C, C)
        "b_act": jnp.zeros((2 * C,), jnp.float32),
        "conv_w": jax.random.uniform(ks[3], (H, K), jnp.float32, -0.5, 0.5),
        "w_fc1": xavier(ks[1], C, 4 * C),            # (4C, C)
        "b_fc1": jnp.zeros((4 * C,), jnp.float32),
        "w_fc2": xavier(ks[2], 4 * C, C),            # (C, 4C)
        "b_fc2": jnp.zeros((C,), jnp.float32),
        "gamma": jnp.ones((C,), jnp.float32),        # LayerNorm affine
        "beta": jnp.zeros((C,), jnp.float32),
    }


if __name__ == "__main__":
    # TODO(synk): weight_dropout on the softmaxed conv weights and the optional mask
    # argument are omitted (eval mode / dropout=0 / mask=None).
    B, T = 2, 8
    d_model, kernel_size, num_heads = 32, 3, 4

    key = jax.random.PRNGKey(0)
    kx, kp = jax.random.split(key)
    x = jax.random.normal(kx, (B, T, d_model), jnp.float32)
    params = make_params(kp, d_model, kernel_size, num_heads)

    ref = lconv_ref(x, params, kernel_size=kernel_size, num_heads=num_heads)

    # f32-MXU path: tight tolerance vs the f32 reference.
    out_f32 = jax.block_until_ready(
        lconv_block(x, params, kernel_size=kernel_size, num_heads=num_heads,
                    compute_dtype=jnp.float32))
    assert out_f32.shape == (B, T, d_model)
    assert jnp.allclose(out_f32, ref, rtol=1e-4, atol=1e-4), "f32 kernel mismatch"

    # bf16-MXU path (shipping config): bf16 matmul operands, f32 everything else.
    out_bf16 = jax.block_until_ready(
        lconv_block(x, params, kernel_size=kernel_size, num_heads=num_heads,
                    compute_dtype=jnp.bfloat16))
    assert out_bf16.shape == (B, T, d_model)
    assert jnp.allclose(out_bf16, ref, rtol=5e-2, atol=5e-2), "bf16 kernel mismatch"

    print("KERNEL_OK")
</pallas_src>

<mosaic_0001>
module attributes {stable_mosaic.version = 11 : i64} {
  func.func @_lconv_kernel(%arg0: i32, %arg1: memref<2x8x128xf32, #tpu.memory_space<vmem>>, %arg2: memref<128x256xf32, #tpu.memory_space<vmem>>, %arg3: memref<1x256xf32, #tpu.memory_space<vmem>>, %arg4: memref<3x128xf32, #tpu.memory_space<vmem>>, %arg5: memref<128x128xf32, #tpu.memory_space<vmem>>, %arg6: memref<1x128xf32, #tpu.memory_space<vmem>>, %arg7: memref<128x128xf32, #tpu.memory_space<vmem>>, %arg8: memref<1x128xf32, #tpu.memory_space<vmem>>, %arg9: memref<1x128xf32, #tpu.memory_space<vmem>>, %arg10: memref<1x128xf32, #tpu.memory_space<vmem>>, %arg11: memref<2x8x128xf32, #tpu.memory_space<vmem>>) attributes {dimension_semantics = [#tpu.dimension_semantics<parallel>], iteration_bounds = array<i64: 1>, scalar_prefetch = 0 : i64, scratch_operands = 0 : i64, tpu.core_type = #tpu.core_type<tc>, window_params = [{transform_indices = @transform_0, window_bounds = array<i64: 2, 8, 128>}, {pipeline_mode = #tpu.pipeline_mode<synchronous>, transform_indices = @transform_1, window_bounds = array<i64: 128, 256>}, {pipeline_mode = #tpu.pipeline_mode<synchronous>, transform_indices = @transform_2, window_bounds = array<i64: 1, 256>}, {pipeline_mode = #tpu.pipeline_mode<synchronous>, transform_indices = @transform_3, window_bounds = array<i64: 3, 128>}, {pipeline_mode = #tpu.pipeline_mode<synchronous>, transform_indices = @transform_4, window_bounds = array<i64: 128, 128>}, {pipeline_mode = #tpu.pipeline_mode<synchronous>, transform_indices = @transform_5, window_bounds = array<i64: 1, 128>}, {pipeline_mode = #tpu.pipeline_mode<synchronous>, transform_indices = @transform_6, window_bounds = array<i64: 128, 128>}, {pipeline_mode = #tpu.pipeline_mode<synchronous>, transform_indices = @transform_7, window_bounds = array<i64: 1, 128>}, {pipeline_mode = #tpu.pipeline_mode<synchronous>, transform_indices = @transform_8, window_bounds = array<i64: 1, 128>}, {pipeline_mode = #tpu.pipeline_mode<synchronous>, transform_indices = @transform_9, window_bounds = array<i64: 1, 128>}, {transform_indices = @transform_10, window_bounds = array<i64: 2, 8, 128>}]} {
    %c0 = arith.constant 0 : index
    %c0_0 = arith.constant 0 : index
    %c0_1 = arith.constant 0 : index
    %0 = vector.load %arg1[%c0, %c0_0, %c0_1] : memref<2x8x128xf32, #tpu.memory_space<vmem>>, vector<2x8x128xf32>
    %1 = vector.shape_cast %0 : vector<2x8x128xf32> to vector<16x128xf32>
    %c0_2 = arith.constant 0 : index
    %c0_3 = arith.constant 0 : index
    %2 = vector.load %arg2[%c0_2, %c0_3] : memref<128x256xf32, #tpu.memory_space<vmem>>, vector<128x256xf32>
    %cst = arith.constant dense<0.000000e+00> : vector<16x256xf32>
    %3 = tpu.matmul %1, %2, %cst {dimension_numbers = #tpu.dot_dimension_numbers<[1], [0], [0], [1], [0, 0, 1, 1], [], []>} : vector<16x128xf32>, vector<128x256xf32>, vector<16x256xf32> -> vector<16x256xf32>
    %c0_4 = arith.constant 0 : index
    %c0_5 = arith.constant 0 : index
    %4 = vector.load %arg3[%c0_4, %c0_5] : memref<1x256xf32, #tpu.memory_space<vmem>>, vector<1x256xf32>
    %5 = vector.broadcast %4 : vector<1x256xf32> to vector<16x256xf32>
    %6 = arith.addf %3, %5 : vector<16x256xf32>
    %7 = vector.extract_strided_slice %6 {offsets = [0, 0], sizes = [16, 128], strides = [1, 1]} : vector<16x256xf32> to vector<16x128xf32>
    %8 = vector.extract_strided_slice %6 {offsets = [0, 128], sizes = [16, 128], strides = [1, 1]} : vector<16x256xf32> to vector<16x128xf32>
    %9 = arith.negf %8 : vector<16x128xf32>
    %10 = math.exp %9 : vector<16x128xf32>
    %cst_6 = arith.constant 1.000000e+00 : f32
    %11 = vector.broadcast %cst_6 : f32 to vector<16x128xf32>
    %12 = arith.addf %11, %10 : vector<16x128xf32>
    %13 = arith.divf %11, %12 : vector<16x128xf32>
    %14 = arith.mulf %7, %13 : vector<16x128xf32>
    %c0_7 = arith.constant 0 : index
    %c0_8 = arith.constant 0 : index
    %15 = vector.load %arg4[%c0_7, %c0_8] : memref<3x128xf32, #tpu.memory_space<vmem>>, vector<3x128xf32>
    %16 = tpu.iota {dimensions = array<i32: 1>} : vector<2x8x1xi32>
    %17 = vector.shape_cast %14 : vector<16x128xf32> to vector<2x8x128xf32>
    %18 = vector.extract_strided_slice %15 {offsets = [1, 0], sizes = [1, 128], strides = [1, 1]} : vector<3x128xf32> to vector<1x128xf32>
    %19 = vector.shape_cast %18 : vector<1x128xf32> to vector<128xf32>
    %20 = vector.shape_cast %19 : vector<128xf32> to vector<1x1x128xf32>
    %21 = vector.broadcast %20 : vector<1x1x128xf32> to vector<2x8x128xf32>
    %22 = arith.mulf %21, %17 : vector<2x8x128xf32>
    %c1_i32 = arith.constant 1 : i32
    %23 = tpu.dynamic_rotate %14 by %c1_i32 dim 0 : vector<16x128xf32>, i32 -> vector<16x128xf32>
    %24 = vector.shape_cast %23 : vector<16x128xf32> to vector<2x8x128xf32>
    %c-1_i32 = arith.constant -1 : i32
    %25 = vector.broadcast %c-1_i32 : i32 to vector<2x8x1xi32>
    %26 = arith.addi %16, %25 : vector<2x8x1xi32>
    %c0_i32 = arith.constant 0 : i32
    %27 = vector.broadcast %c0_i32 : i32 to vector<2x8x1xi32>
    %28 = arith.cmpi sge, %26, %27 : vector<2x8x1xi32>
    %c-1_i32_9 = arith.constant -1 : i32
    %29 = vector.broadcast %c-1_i32_9 : i32 to vector<2x8x1xi32>
    %30 = arith.addi %16, %29 : vector<2x8x1xi32>
    %c8_i32 = arith.constant 8 : i32
    %31 = vector.broadcast %c8_i32 : i32 to vector<2x8x1xi32>
    %32 = arith.cmpi slt, %30, %31 : vector<2x8x1xi32>
    %33 = arith.andi %28, %32 : vector<2x8x1xi1>
    %34 = vector.extract_strided_slice %15 {offsets = [0, 0], sizes = [1, 128], strides = [1, 1]} : vector<3x128xf32> to vector<1x128xf32>
    %35 = vector.shape_cast %34 : vector<1x128xf32> to vector<128xf32>
    %36 = vector.shape_cast %35 : vector<128xf32> to vector<1x1x128xf32>
    %cst_10 = arith.constant 0.000000e+00 : f32
    %37 = vector.shape_cast %33 : vector<2x8x1xi1> to vector<2x8x1xi1>
    %38 = vector.broadcast %37 : vector<2x8x1xi1> to vector<2x8x128xi1>
    %39 = vector.broadcast %cst_10 : f32 to vector<2x8x128xf32>
    %40 = arith.select %38, %24, %39 : vector<2x8x128xi1>, vector<2x8x128xf32>
    %41 = vector.broadcast %36 : vector<1x1x128xf32> to vector<2x8x128xf32>
    %42 = arith.mulf %41, %40 : vector<2x8x128xf32>
    %43 = arith.addf %22, %42 : vector<2x8x128xf32>
    %c15_i32 = arith.constant 15 : i32
    %44 = tpu.dynamic_rotate %14 by %c15_i32 dim 0 : vector<16x128xf32>, i32 -> vector<16x128xf32>
    %45 = vector.shape_cast %44 : vector<16x128xf32> to vector<2x8x128xf32>
    %c1_i32_11 = arith.constant 1 : i32
    %46 = vector.broadcast %c1_i32_11 : i32 to vector<2x8x1xi32>
    %47 = arith.addi %16, %46 : vector<2x8x1xi32>
    %c0_i32_12 = arith.constant 0 : i32
    %48 = vector.broadcast %c0_i32_12 : i32 to vector<2x8x1xi32>
    %49 = arith.cmpi sge, %47, %48 : vector<2x8x1xi32>
    %c1_i32_13 = arith.constant 1 : i32
    %50 = vector.broadcast %c1_i32_13 : i32 to vector<2x8x1xi32>
    %51 = arith.addi %16, %50 : vector<2x8x1xi32>
    %c8_i32_14 = arith.constant 8 : i32
    %52 = vector.broadcast %c8_i32_14 : i32 to vector<2x8x1xi32>
    %53 = arith.cmpi slt, %51, %52 : vector<2x8x1xi32>
    %54 = arith.andi %49, %53 : vector<2x8x1xi1>
    %55 = vector.extract_strided_slice %15 {offsets = [2, 0], sizes = [1, 128], strides = [1, 1]} : vector<3x128xf32> to vector<1x128xf32>
    %56 = vector.shape_cast %55 : vector<1x128xf32> to vector<128xf32>
    %57 = vector.shape_cast %56 : vector<128xf32> to vector<1x1x128xf32>
    %cst_15 = arith.constant 0.000000e+00 : f32
    %58 = vector.shape_cast %54 : vector<2x8x1xi1> to vector<2x8x1xi1>
    %59 = vector.broadcast %58 : vector<2x8x1xi1> to vector<2x8x128xi1>
    %60 = vector.broadcast %cst_15 : f32 to vector<2x8x128xf32>
    %61 = arith.select %59, %45, %60 : vector<2x8x128xi1>, vector<2x8x128xf32>
    %62 = vector.broadcast %57 : vector<1x1x128xf32> to vector<2x8x128xf32>
    %63 = arith.mulf %62, %61 : vector<2x8x128xf32>
    %64 = arith.addf %43, %63 : vector<2x8x128xf32>
    %65 = arith.addf %0, %64 : vector<2x8x128xf32>
    %66 = vector.shape_cast %65 : vector<2x8x128xf32> to vector<16x128xf32>
    %cst_16 = arith.constant 0.000000e+00 : f32
    %67 = vector.broadcast %cst_16 : f32 to vector<16x128xf32>
    %c0_17 = arith.constant 0 : index
    %c0_18 = arith.constant 0 : index
    %68 = vector.load %arg5[%c0_17, %c0_18] : memref<128x128xf32, #tpu.memory_space<vmem>>, vector<128x128xf32>
    %cst_19 = arith.constant dense<0.000000e+00> : vector<16x128xf32>
    %69 = tpu.matmul %66, %68, %cst_19 {dimension_numbers = #tpu.dot_dimension_numbers<[1], [0], [0], [1], [0, 0, 1, 1], [], []>} : vector<16x128xf32>, vector<128x128xf32>, vector<16x128xf32> -> vector<16x128xf32>
    %c0_20 = arith.constant 0 : index
    %c0_21 = arith.constant 0 : index
    %70 = vector.load %arg6[%c0_20, %c0_21] : memref<1x128xf32, #tpu.memory_space<vmem>>, vector<1x128xf32>
    %71 = vector.broadcast %70 : vector<1x128xf32> to vector<16x128xf32>
    %72 = arith.addf %69, %71 : vector<16x128xf32>
    %cst_22 = arith.constant 0.000000e+00 : f32
    %73 = vector.broadcast %cst_22 : f32 to vector<16x128xf32>
    %74 = arith.maximumf %72, %73 : vector<16x128xf32>
    %c0_23 = arith.constant 0 : index
    %c0_24 = arith.constant 0 : index
    %75 = vector.load %arg7[%c0_23, %c0_24] : memref<128x128xf32, #tpu.memory_space<vmem>>, vector<128x128xf32>
    %cst_25 = arith.constant dense<0.000000e+00> : vector<16x128xf32>
    %76 = tpu.matmul %74, %75, %cst_25 {dimension_numbers = #tpu.dot_dimension_numbers<[1], [0], [0], [1], [0, 0, 1, 1], [], []>} : vector<16x128xf32>, vector<128x128xf32>, vector<16x128xf32> -> vector<16x128xf32>
    %77 = arith.addf %67, %76 : vector<16x128xf32>
    %78 = arith.addf %66, %77 : vector<16x128xf32>
    %c0_26 = arith.constant 0 : index
    %c0_27 = arith.constant 0 : index
    %79 = vector.load %arg8[%c0_26, %c0_27] : memref<1x128xf32, #tpu.memory_space<vmem>>, vector<1x128xf32>
    %80 = vector.broadcast %79 : vector<1x128xf32> to vector<16x128xf32>
    %81 = arith.addf %78, %80 : vector<16x128xf32>
    %cst_28 = arith.constant dense<0.000000e+00> : vector<16xf32>
    %82 = vector.multi_reduction <add>, %81, %cst_28 [1] : vector<16x128xf32> to vector<16xf32>
    %83 = vector.shape_cast %82 : vector<16xf32> to vector<16x1xf32>
    %cst_29 = arith.constant 3.125000e-02 : f32
    %84 = vector.broadcast %cst_29 : f32 to vector<16x1xf32>
    %85 = arith.mulf %83, %84 : vector<16x1xf32>
    %86 = vector.broadcast %85 : vector<16x1xf32> to vector<16x128xf32>
    %87 = arith.subf %81, %86 : vector<16x128xf32>
    %88 = tpu.iota {dimensions = array<i32: 1>} : vector<1x128xi32>
    %c32_i32 = arith.constant 32 : i32
    %89 = vector.broadcast %c32_i32 : i32 to vector<1x128xi32>
    %90 = arith.cmpi slt, %88, %89 : vector<1x128xi32>
    %cst_30 = arith.constant 0.000000e+00 : f32
    %91 = vector.shape_cast %90 : vector<1x128xi1> to vector<1x128xi1>
    %92 = vector.broadcast %91 : vector<1x128xi1> to vector<16x128xi1>
    %93 = vector.broadcast %cst_30 : f32 to vector<16x128xf32>
    %94 = arith.select %92, %87, %93 : vector<16x128xi1>, vector<16x128xf32>
    %95 = arith.mulf %94, %94 : vector<16x128xf32>
    %cst_31 = arith.constant dense<0.000000e+00> : vector<16xf32>
    %96 = vector.multi_reduction <add>, %95, %cst_31 [1] : vector<16x128xf32> to vector<16xf32>
    %97 = vector.shape_cast %96 : vector<16xf32> to vector<16x1xf32>
    %cst_32 = arith.constant 3.125000e-02 : f32
    %98 = vector.broadcast %cst_32 : f32 to vector<16x1xf32>
    %99 = arith.mulf %97, %98 : vector<16x1xf32>
    %cst_33 = arith.constant 9.99999974E-6 : f32
    %100 = vector.broadcast %cst_33 : f32 to vector<16x1xf32>
    %101 = arith.addf %99, %100 : vector<16x1xf32>
    %102 = math.rsqrt %101 : vector<16x1xf32>
    %103 = vector.broadcast %102 : vector<16x1xf32> to vector<16x128xf32>
    %104 = arith.mulf %87, %103 : vector<16x128xf32>
    %c0_34 = arith.constant 0 : index
    %c0_35 = arith.constant 0 : index
    %105 = vector.load %arg9[%c0_34, %c0_35] : memref<1x128xf32, #tpu.memory_space<vmem>>, vector<1x128xf32>
    %106 = vector.broadcast %105 : vector<1x128xf32> to vector<16x128xf32>
    %107 = arith.mulf %104, %106 : vector<16x128xf32>
    %c0_36 = arith.constant 0 : index
    %c0_37 = arith.constant 0 : index
    %108 = vector.load %arg10[%c0_36, %c0_37] : memref<1x128xf32, #tpu.memory_space<vmem>>, vector<1x128xf32>
    %109 = vector.broadcast %108 : vector<1x128xf32> to vector<16x128xf32>
    %110 = arith.addf %107, %109 : vector<16x128xf32>
    %111 = vector.shape_cast %110 : vector<16x128xf32> to vector<2x8x128xf32>
    %c0_38 = arith.constant 0 : index
    %c0_39 = arith.constant 0 : index
    %c0_40 = arith.constant 0 : index
    %112 = vector.load %arg11[%c0_38, %c0_39, %c0_40] : memref<2x8x128xf32, #tpu.memory_space<vmem>>, vector<2x8x128xf32>
    tpu.vector_store %arg11[%c0_38, %c0_39, %c0_40], %111 {strides = array<i32>} : memref<2x8x128xf32, #tpu.memory_space<vmem>>, vector<2x8x128xf32>,
    return
  }
  func.func @transform_0(%arg0: i32) -> (i32, i32, i32) {
    %c0_i32 = arith.constant 0 : i32
    %c0_i32_0 = arith.constant 0 : i32
    %c0_i32_1 = arith.constant 0 : i32
    return %arg0, %c0_i32, %c0_i32_0 : i32, i32, i32
  }
  func.func @transform_1(%arg0: i32) -> (i32, i32) {
    %c0_i32 = arith.constant 0 : i32
    %c0_i32_0 = arith.constant 0 : i32
    %c0_i32_1 = arith.constant 0 : i32
    return %c0_i32, %c0_i32_0 : i32, i32
  }
  func.func @transform_2(%arg0: i32) -> (i32, i32) {
    %c0_i32 = arith.constant 0 : i32
    %c0_i32_0 = arith.constant 0 : i32
    %c0_i32_1 = arith.constant 0 : i32
    return %c0_i32, %c0_i32_0 : i32, i32
  }
  func.func @transform_3(%arg0: i32) -> (i32, i32) {
    %c0_i32 = arith.constant 0 : i32
    %c0_i32_0 = arith.constant 0 : i32
    %c0_i32_1 = arith.constant 0 : i32
    return %c0_i32, %c0_i32_0 : i32, i32
  }
  func.func @transform_4(%arg0: i32) -> (i32, i32) {
    %c0_i32 = arith.constant 0 : i32
    %c0_i32_0 = arith.constant 0 : i32
    %c0_i32_1 = arith.constant 0 : i32
    return %c0_i32, %c0_i32_0 : i32, i32
  }
  func.func @transform_5(%arg0: i32) -> (i32, i32) {
    %c0_i32 = arith.constant 0 : i32
    %c0_i32_0 = arith.constant 0 : i32
    %c0_i32_1 = arith.constant 0 : i32
    return %c0_i32, %c0_i32_0 : i32, i32
  }
  func.func @transform_6(%arg0: i32) -> (i32, i32) {
    %c0_i32 = arith.constant 0 : i32
    %c0_i32_0 = arith.constant 0 : i32
    %c0_i32_1 = arith.constant 0 : i32
    return %c0_i32, %c0_i32_0 : i32, i32
  }
  func.func @transform_7(%arg0: i32) -> (i32, i32) {
    %c0_i32 = arith.constant 0 : i32
    %c0_i32_0 = arith.constant 0 : i32
    %c0_i32_1 = arith.constant 0 : i32
    return %c0_i32, %c0_i32_0 : i32, i32
  }
  func.func @transform_8(%arg0: i32) -> (i32, i32) {
    %c0_i32 = arith.constant 0 : i32
    %c0_i32_0 = arith.constant 0 : i32
    %c0_i32_1 = arith.constant 0 : i32
    return %c0_i32, %c0_i32_0 : i32, i32
  }
  func.func @transform_9(%arg0: i32) -> (i32, i32) {
    %c0_i32 = arith.constant 0 : i32
    %c0_i32_0 = arith.constant 0 : i32
    %c0_i32_1 = arith.constant 0 : i32
    return %c0_i32, %c0_i32_0 : i32, i32
  }
  func.func @transform_10(%arg0: i32) -> (i32, i32, i32) {
    %c0_i32 = arith.constant 0 : i32
    %c0_i32_0 = arith.constant 0 : i32
    %c0_i32_1 = arith.constant 0 : i32
    return %arg0, %c0_i32, %c0_i32_0 : i32, i32, i32
  }
}

module attributes {stable_mosaic.version = 11 : i64} {
  func.func @_lconv_kernel(%arg0: i32, %arg1: memref<2x8x128xf32, #tpu.memory_space<vmem>>, %arg2: memref<128x256xf32, #tpu.memory_space<vmem>>, %arg3: memref<1x256xf32, #tpu.memory_space<vmem>>, %arg4: memref<3x128xf32, #tpu.memory_space<vmem>>, %arg5: memref<128x128xf32, #tpu.memory_space<vmem>>, %arg6: memref<1x128xf32, #tpu.memory_space<vmem>>, %arg7: memref<128x128xf32, #tpu.memory_space<vmem>>, %arg8: memref<1x128xf32, #tpu.memory_space<vmem>>, %arg9: memref<1x128xf32, #tpu.memory_space<vmem>>, %arg10: memref<1x128xf32, #tpu.memory_space<vmem>>, %arg11: memref<2x8x128xf32, #tpu.memory_space<vmem>>) attributes {dimension_semantics = [#tpu.dimension_semantics<parallel>], iteration_bounds = array<i64: 1>, scalar_prefetch = 0 : i64, scratch_operands = 0 : i64, tpu.core_type = #tpu.core_type<tc>, window_params = [{transform_indices = @transform_0, window_bounds = array<i64: 2, 8, 128>}, {pipeline_mode = #tpu.pipeline_mode<synchronous>, transform_indices = @transform_1, window_bounds = array<i64: 128, 256>}, {pipeline_mode = #tpu.pipeline_mode<synchronous>, transform_indices = @transform_2, window_bounds = array<i64: 1, 256>}, {pipeline_mode = #tpu.pipeline_mode<synchronous>, transform_indices = @transform_3, window_bounds = array<i64: 3, 128>}, {pipeline_mode = #tpu.pipeline_mode<synchronous>, transform_indices = @transform_4, window_bounds = array<i64: 128, 128>}, {pipeline_mode = #tpu.pipeline_mode<synchronous>, transform_indices = @transform_5, window_bounds = array<i64: 1, 128>}, {pipeline_mode = #tpu.pipeline_mode<synchronous>, transform_indices = @transform_6, window_bounds = array<i64: 128, 128>}, {pipeline_mode = #tpu.pipeline_mode<synchronous>, transform_indices = @transform_7, window_bounds = array<i64: 1, 128>}, {pipeline_mode = #tpu.pipeline_mode<synchronous>, transform_indices = @transform_8, window_bounds = array<i64: 1, 128>}, {pipeline_mode = #tpu.pipeline_mode<synchronous>, transform_indices = @transform_9, window_bounds = array<i64: 1, 128>}, {transform_indices = @transform_10, window_bounds = array<i64: 2, 8, 128>}]} {
    %c0 = arith.constant 0 : index
    %c0_0 = arith.constant 0 : index
    %c0_1 = arith.constant 0 : index
    %0 = vector.load %arg1[%c0, %c0_0, %c0_1] : memref<2x8x128xf32, #tpu.memory_space<vmem>>, vector<2x8x128xf32>
    %1 = vector.shape_cast %0 : vector<2x8x128xf32> to vector<16x128xf32>
    %c0_2 = arith.constant 0 : index
    %c0_3 = arith.constant 0 : index
    %2 = vector.load %arg2[%c0_2, %c0_3] : memref<128x256xf32, #tpu.memory_space<vmem>>, vector<128x256xf32>
    %cst = arith.constant dense<0.000000e+00> : vector<16x256xf32>
    %3 = tpu.matmul %1, %2, %cst {dimension_numbers = #tpu.dot_dimension_numbers<[1], [0], [0], [1], [0, 0, 1, 1], [], []>} : vector<16x128xf32>, vector<128x256xf32>, vector<16x256xf32> -> vector<16x256xf32>
    %c0_4 = arith.constant 0 : index
    %c0_5 = arith.constant 0 : index
    %4 = vector.load %arg3[%c0_4, %c0_5] : memref<1x256xf32, #tpu.memory_space<vmem>>, vector<1x256xf32>
    %5 = vector.broadcast %4 : vector<1x256xf32> to vector<16x256xf32>
    %6 = arith.addf %3, %5 : vector<16x256xf32>
    %7 = vector.extract_strided_slice %6 {offsets = [0, 0], sizes = [16, 128], strides = [1, 1]} : vector<16x256xf32> to vector<16x128xf32>
    %8 = vector.extract_strided_slice %6 {offsets = [0, 128], sizes = [16, 128], strides = [1, 1]} : vector<16x256xf32> to vector<16x128xf32>
    %9 = arith.negf %8 : vector<16x128xf32>
    %10 = math.exp %9 : vector<16x128xf32>
    %cst_6 = arith.constant 1.000000e+00 : f32
    %11 = vector.broadcast %cst_6 : f32 to vector<16x128xf32>
    %12 = arith.addf %11, %10 : vector<16x128xf32>
    %13 = arith.divf %11, %12 : vector<16x128xf32>
    %14 = arith.mulf %7, %13 : vector<16x128xf32>
    %c0_7 = arith.constant 0 : index
    %c0_8 = arith.constant 0 : index
    %15 = vector.load %arg4[%c0_7, %c0_8] : memref<3x128xf32, #tpu.memory_space<vmem>>, vector<3x128xf32>
    %16 = tpu.iota {dimensions = array<i32: 1>} : vector<2x8x1xi32>
    %17 = vector.shape_cast %14 : vector<16x128xf32> to vector<2x8x128xf32>
    %18 = vector.extract_strided_slice %15 {offsets = [1, 0], sizes = [1, 128], strides = [1, 1]} : vector<3x128xf32> to vector<1x128xf32>
    %19 = vector.shape_cast %18 : vector<1x128xf32> to vector<128xf32>
    %20 = vector.shape_cast %19 : vector<128xf32> to vector<1x1x128xf32>
    %21 = vector.broadcast %20 : vector<1x1x128xf32> to vector<2x8x128xf32>
    %22 = arith.mulf %21, %17 : vector<2x8x128xf32>
    %c1_i32 = arith.constant 1 : i32
    %23 = tpu.dynamic_rotate %14 by %c1_i32 dim 0 : vector<16x128xf32>, i32 -> vector<16x128xf32>
    %24 = vector.shape_cast %23 : vector<16x128xf32> to vector<2x8x128xf32>
    %c-1_i32 = arith.constant -1 : i32
    %25 = vector.broadcast %c-1_i32 : i32 to vector<2x8x1xi32>
    %26 = arith.addi %16, %25 : vector<2x8x1xi32>
    %c0_i32 = arith.constant 0 : i32
    %27 = vector.broadcast %c0_i32 : i32 to vector<2x8x1xi32>
    %28 = arith.cmpi sge, %26, %27 : vector<2x8x1xi32>
    %c-1_i32_9 = arith.constant -1 : i32
    %29 = vector.broadcast %c-1_i32_9 : i32 to vector<2x8x1xi32>
    %30 = arith.addi %16, %29 : vector<2x8x1xi32>
    %c8_i32 = arith.constant 8 : i32
    %31 = vector.broadcast %c8_i32 : i32 to vector<2x8x1xi32>
    %32 = arith.cmpi slt, %30, %31 : vector<2x8x1xi32>
    %33 = arith.andi %28, %32 : vector<2x8x1xi1>
    %34 = vector.extract_strided_slice %15 {offsets = [0, 0], sizes = [1, 128], strides = [1, 1]} : vector<3x128xf32> to vector<1x128xf32>
    %35 = vector.shape_cast %34 : vector<1x128xf32> to vector<128xf32>
    %36 = vector.shape_cast %35 : vector<128xf32> to vector<1x1x128xf32>
    %cst_10 = arith.constant 0.000000e+00 : f32
    %37 = vector.shape_cast %33 : vector<2x8x1xi1> to vector<2x8x1xi1>
    %38 = vector.broadcast %37 : vector<2x8x1xi1> to vector<2x8x128xi1>
    %39 = vector.broadcast %cst_10 : f32 to vector<2x8x128xf32>
    %40 = arith.select %38, %24, %39 : vector<2x8x128xi1>, vector<2x8x128xf32>
    %41 = vector.broadcast %36 : vector<1x1x128xf32> to vector<2x8x128xf32>
    %42 = arith.mulf %41, %40 : vector<2x8x128xf32>
    %43 = arith.addf %22, %42 : vector<2x8x128xf32>
    %c15_i32 = arith.constant 15 : i32
    %44 = tpu.dynamic_rotate %14 by %c15_i32 dim 0 : vector<16x128xf32>, i32 -> vector<16x128xf32>
    %45 = vector.shape_cast %44 : vector<16x128xf32> to vector<2x8x128xf32>
    %c1_i32_11 = arith.constant 1 : i32
    %46 = vector.broadcast %c1_i32_11 : i32 to vector<2x8x1xi32>
    %47 = arith.addi %16, %46 : vector<2x8x1xi32>
    %c0_i32_12 = arith.constant 0 : i32
    %48 = vector.broadcast %c0_i32_12 : i32 to vector<2x8x1xi32>
    %49 = arith.cmpi sge, %47, %48 : vector<2x8x1xi32>
    %c1_i32_13 = arith.constant 1 : i32
    %50 = vector.broadcast %c1_i32_13 : i32 to vector<2x8x1xi32>
    %51 = arith.addi %16, %50 : vector<2x8x1xi32>
    %c8_i32_14 = arith.constant 8 : i32
    %52 = vector.broadcast %c8_i32_14 : i32 to vector<2x8x1xi32>
    %53 = arith.cmpi slt, %51, %52 : vector<2x8x1xi32>
    %54 = arith.andi %49, %53 : vector<2x8x1xi1>
    %55 = vector.extract_strided_slice %15 {offsets = [2, 0], sizes = [1, 128], strides = [1, 1]} : vector<3x128xf32> to vector<1x128xf32>
    %56 = vector.shape_cast %55 : vector<1x128xf32> to vector<128xf32>
    %57 = vector.shape_cast %56 : vector<128xf32> to vector<1x1x128xf32>
    %cst_15 = arith.constant 0.000000e+00 : f32
    %58 = vector.shape_cast %54 : vector<2x8x1xi1> to vector<2x8x1xi1>
    %59 = vector.broadcast %58 : vector<2x8x1xi1> to vector<2x8x128xi1>
    %60 = vector.broadcast %cst_15 : f32 to vector<2x8x128xf32>
    %61 = arith.select %59, %45, %60 : vector<2x8x128xi1>, vector<2x8x128xf32>
    %62 = vector.broadcast %57 : vector<1x1x128xf32> to vector<2x8x128xf32>
    %63 = arith.mulf %62, %61 : vector<2x8x128xf32>
    %64 = arith.addf %43, %63 : vector<2x8x128xf32>
    %65 = arith.addf %0, %64 : vector<2x8x128xf32>
    %66 = vector.shape_cast %65 : vector<2x8x128xf32> to vector<16x128xf32>
    %cst_16 = arith.constant 0.000000e+00 : f32
    %67 = vector.broadcast %cst_16 : f32 to vector<16x128xf32>
    %c0_17 = arith.constant 0 : index
    %c0_18 = arith.constant 0 : index
    %68 = vector.load %arg5[%c0_17, %c0_18] : memref<128x128xf32, #tpu.memory_space<vmem>>, vector<128x128xf32>
    %cst_19 = arith.constant dense<0.000000e+00> : vector<16x128xf32>
    %69 = tpu.matmul %66, %68, %cst_19 {dimension_numbers = #tpu.dot_dimension_numbers<[1], [0], [0], [1], [0, 0, 1, 1], [], []>} : vector<16x128xf32>, vector<128x128xf32>, vector<16x128xf32> -> vector<16x128xf32>
    %c0_20 = arith.constant 0 : index
    %c0_21 = arith.constant 0 : index
    %70 = vector.load %arg6[%c0_20, %c0_21] : memref<1x128xf32, #tpu.memory_space<vmem>>, vector<1x128xf32>
    %71 = vector.broadcast %70 : vector<1x128xf32> to vector<16x128xf32>
    %72 = arith.addf %69, %71 : vector<16x128xf32>
    %cst_22 = arith.constant 0.000000e+00 : f32
    %73 = vector.broadcast %cst_22 : f32 to vector<16x128xf32>
    %74 = arith.maximumf %72, %73 : vector<16x128xf32>
    %c0_23 = arith.constant 0 : index
    %c0_24 = arith.constant 0 : index
    %75 = vector.load %arg7[%c0_23, %c0_24] : memref<128x128xf32, #tpu.memory_space<vmem>>, vector<128x128xf32>
    %cst_25 = arith.constant dense<0.000000e+00> : vector<16x128xf32>
    %76 = tpu.matmul %74, %75, %cst_25 {dimension_numbers = #tpu.dot_dimension_numbers<[1], [0], [0], [1], [0, 0, 1, 1], [], []>} : vector<16x128xf32>, vector<128x128xf32>, vector<16x128xf32> -> vector<16x128xf32>
    %77 = arith.addf %67, %76 : vector<16x128xf32>
    %78 = arith.addf %66, %77 : vector<16x128xf32>
    %c0_26 = arith.constant 0 : index
    %c0_27 = arith.constant 0 : index
    %79 = vector.load %arg8[%c0_26, %c0_27] : memref<1x128xf32, #tpu.memory_space<vmem>>, vector<1x128xf32>
    %80 = vector.broadcast %79 : vector<1x128xf32> to vector<16x128xf32>
    %81 = arith.addf %78, %80 : vector<16x128xf32>
    %cst_28 = arith.constant dense<0.000000e+00> : vector<16xf32>
    %82 = vector.multi_reduction <add>, %81, %cst_28 [1] : vector<16x128xf32> to vector<16xf32>
    %83 = vector.shape_cast %82 : vector<16xf32> to vector<16x1xf32>
    %cst_29 = arith.constant 3.125000e-02 : f32
    %84 = vector.broadcast %cst_29 : f32 to vector<16x1xf32>
    %85 = arith.mulf %83, %84 : vector<16x1xf32>
    %86 = vector.broadcast %85 : vector<16x1xf32> to vector<16x128xf32>
    %87 = arith.subf %81, %86 : vector<16x128xf32>
    %88 = tpu.iota {dimensions = array<i32: 1>} : vector<1x128xi32>
    %c32_i32 = arith.constant 32 : i32
    %89 = vector.broadcast %c32_i32 : i32 to vector<1x128xi32>
    %90 = arith.cmpi slt, %88, %89 : vector<1x128xi32>
    %cst_30 = arith.constant 0.000000e+00 : f32
    %91 = vector.shape_cast %90 : vector<1x128xi1> to vector<1x128xi1>
    %92 = vector.broadcast %91 : vector<1x128xi1> to vector<16x128xi1>
    %93 = vector.broadcast %cst_30 : f32 to vector<16x128xf32>
    %94 = arith.select %92, %87, %93 : vector<16x128xi1>, vector<16x128xf32>
    %95 = arith.mulf %94, %94 : vector<16x128xf32>
    %cst_31 = arith.constant dense<0.000000e+00> : vector<16xf32>
    %96 = vector.multi_reduction <add>, %95, %cst_31 [1] : vector<16x128xf32> to vector<16xf32>
    %97 = vector.shape_cast %96 : vector<16xf32> to vector<16x1xf32>
    %cst_32 = arith.constant 3.125000e-02 : f32
    %98 = vector.broadcast %cst_32 : f32 to vector<16x1xf32>
    %99 = arith.mulf %97, %98 : vector<16x1xf32>
    %cst_33 = arith.constant 9.99999974E-6 : f32
    %100 = vector.broadcast %cst_33 : f32 to vector<16x1xf32>
    %101 = arith.addf %99, %100 : vector<16x1xf32>
    %102 = math.rsqrt %101 : vector<16x1xf32>
    %103 = vector.broadcast %102 : vector<16x1xf32> to vector<16x128xf32>
    %104 = arith.mulf %87, %103 : vector<16x128xf32>
    %c0_34 = arith.constant 0 : index
    %c0_35 = arith.constant 0 : index
    %105 = vector.load %arg9[%c0_34, %c0_35] : memref<1x128xf32, #tpu.memory_space<vmem>>, vector<1x128xf32>
    %106 = vector.broadcast %105 : vector<1x128xf32> to vector<16x128xf32>
    %107 = arith.mulf %104, %106 : vector<16x128xf32>
    %c0_36 = arith.constant 0 : index
    %c0_37 = arith.constant 0 : index
    %108 = vector.load %arg10[%c0_36, %c0_37] : memref<1x128xf32, #tpu.memory_space<vmem>>, vector<1x128xf32>
    %109 = vector.broadcast %108 : vector<1x128xf32> to vector<16x128xf32>
    %110 = arith.addf %107, %109 : vector<16x128xf32>
    %111 = vector.shape_cast %110 : vector<16x128xf32> to vector<2x8x128xf32>
    %c0_38 = arith.constant 0 : index
    %c0_39 = arith.constant 0 : index
    %c0_40 = arith.constant 0 : index
    %112 = vector.load %arg11[%c0_38, %c0_39, %c0_40] : memref<2x8x128xf32, #tpu.memory_space<vmem>>, vector<2x8x128xf32>
    tpu.vector_store %arg11[%c0_38, %c0_39, %c0_40], %111 {strides = array<i32>} : memref<2x8x128xf32, #tpu.memory_space<vmem>>, vector<2x8x128xf32>,
    return
  }
  func.func @transform_0(%arg0: i32) -> (i32, i32, i32) {
    %c0_i32 = arith.constant 0 : i32
    %c0_i32_0 = arith.constant 0 : i32
    %c0_i32_1 = arith.constant 0 : i32
    return %arg0, %c0_i32, %c0_i32_0 : i32, i32, i32
  }
  func.func @transform_1(%arg0: i32) -> (i32, i32) {
    %c0_i32 = arith.constant 0 : i32
    %c0_i32_0 = arith.constant 0 : i32
    %c0_i32_1 = arith.constant 0 : i32
    return %c0_i32, %c0_i32_0 : i32, i32
  }
  func.func @transform_2(%arg0: i32) -> (i32, i32) {
    %c0_i32 = arith.constant 0 : i32
    %c0_i32_0 = arith.constant 0 : i32
    %c0_i32_1 = arith.constant 0 : i32
    return %c0_i32, %c0_i32_0 : i32, i32
  }
  func.func @transform_3(%arg0: i32) -> (i32, i32) {
    %c0_i32 = arith.constant 0 : i32
    %c0_i32_0 = arith.constant 0 : i32
    %c0_i32_1 = arith.constant 0 : i32
    return %c0_i32, %c0_i32_0 : i32, i32
  }
  func.func @transform_4(%arg0: i32) -> (i32, i32) {
    %c0_i32 = arith.constant 0 : i32
    %c0_i32_0 = arith.constant 0 : i32
    %c0_i32_1 = arith.constant 0 : i32
    return %c0_i32, %c0_i32_0 : i32, i32
  }
  func.func @transform_5(%arg0: i32) -> (i32, i32) {
    %c0_i32 = arith.constant 0 : i32
    %c0_i32_0 = arith.constant 0 : i32
    %c0_i32_1 = arith.constant 0 : i32
    return %c0_i32, %c0_i32_0 : i32, i32
  }
  func.func @transform_6(%arg0: i32) -> (i32, i32) {
    %c0_i32 = arith.constant 0 : i32
    %c0_i32_0 = arith.constant 0 : i32
    %c0_i32_1 = arith.constant 0 : i32
    return %c0_i32, %c0_i32_0 : i32, i32
  }
  func.func @transform_7(%arg0: i32) -> (i32, i32) {
    %c0_i32 = arith.constant 0 : i32
    %c0_i32_0 = arith.constant 0 : i32
    %c0_i32_1 = arith.constant 0 : i32
    return %c0_i32, %c0_i32_0 : i32, i32
  }
  func.func @transform_8(%arg0: i32) -> (i32, i32) {
    %c0_i32 = arith.constant 0 : i32
    %c0_i32_0 = arith.constant 0 : i32
    %c0_i32_1 = arith.constant 0 : i32
    return %c0_i32, %c0_i32_0 : i32, i32
  }
  func.func @transform_9(%arg0: i32) -> (i32, i32) {
    %c0_i32 = arith.constant 0 : i32
    %c0_i32_0 = arith.constant 0 : i32
    %c0_i32_1 = arith.constant 0 : i32
    return %c0_i32, %c0_i32_0 : i32, i32
  }
  func.func @transform_10(%arg0: i32) -> (i32, i32, i32) {
    %c0_i32 = arith.constant 0 : i32
    %c0_i32_0 = arith.constant 0 : i32
    %c0_i32_1 = arith.constant 0 : i32
    return %arg0, %c0_i32, %c0_i32_0 : i32, i32, i32
  }
}

</mosaic_0001>

<bundles_post_ra>
// kernel: tpu_custom_call.1
= control target key start
LH: loop header
LB: loop body
LE: loop exit
PB: predicated region body
PF: predicated region fallthrough
CT: control target
= control target key end

     0   :  { %15 = vsyncpa [#allocation3], 0  ;;  %s1073_s0 = inlined_call_operand.hbm [shape: f32[2,8,128], index: 0, kind: input, shape index: {}]   ;;  %s1074_s1 = inlined_call_operand.hbm [shape: f32[128,256], index: 1, kind: input, shape index: {}]   ;;  %s1075_s2 = inlined_call_operand.vmem [shape: f32[1,256], index: 2, kind: input, shape index: {}]   ;;  %s1076_s3 = inlined_call_operand.vmem [shape: f32[3,128], index: 3, kind: input, shape index: {}]   ;;  %s1077_s4 = inlined_call_operand.hbm [shape: f32[128,128], index: 4, kind: input, shape index: {}]   ;;  %s1078_s5 = inlined_call_operand.vmem [shape: f32[1,128], index: 5, kind: input, shape index: {}]   ;;  %s1079_s6 = inlined_call_operand.hbm [shape: f32[128,128], index: 6, kind: input, shape index: {}]   ;;  %s1080_s7 = inlined_call_operand.vmem [shape: f32[1,128], index: 7, kind: input, shape index: {}]   ;;  %s1081_s8 = inlined_call_operand.vmem [shape: f32[1,128], index: 8, kind: input, shape index: {}]   ;;  %s1082_s9 = inlined_call_operand.vmem [shape: f32[1,128], index: 9, kind: input, shape index: {}]   ;;  %s1083_s10 = inlined_call_operand.hbm [shape: f32[2,8,128], index: 10, kind: output, shape index: {}]  }
   0x1   :  { %16 = vsyncpa [#allocation6], 0 }
   0x2   :  { %17 = vsyncpa [#allocation9], 0 }
   0x3   :  { %18 = vsyncpa [#allocation4], 0  ;;  %s899_s13 = smov [#allocation5]   ;;  %s781_s17 = scalar_lea.hbm %s1074_s1, 4096 }
   0x4   :  { %s36_s14 = sshll.u32 %s899_s13, 4  ;;  %p782_p0 = scmp.ne.s32.totalorder %s1074_s1, %s781_s17  ;;  %s37_s14 = int_to_ptr.vmem [resolvable:$true] %s36_s14 }
   0x5   :  { %p785_p1 = scmp.lt.u32.totalorder %s781_s17, %s1074_s1 }
   0x7   :  { %p787_p2 = pnand %p785_p1, %p782_p0 }
   0x9   :  { %790 = shalt.err (!%p787_p2)
}
   0xa   :  { %s791_s22 = scalar_lea.vmem %s37_s14, 4096  ;;  %p796_p4 = scmp.lt.s32.totalorder %s37_s14, %s37_s14 }
   0xb   :  { %p792_p3 = scmp.ne.s32.totalorder %s37_s14, %s791_s22  ;;  %p797_p5 = scmp.lt.s32.totalorder %s791_s22, %s791_s22 }
   0xd   :  { %p798_p6 = por %p797_p5, %p796_p4 }
   0xf   :  { %p799_p7 = pnand %p798_p6, %p792_p3 }
  0x11   :  { %802 = shalt.err (!%p799_p7)
}
  0x12   :  { %s900_s23 = smov 256   ;;  %s901_s24 = smov 16  }
  0x13   :  { %42 = dma.hbm_to_vmem [thread:$0]  %s1074_s1, 4096, %s37_s14, [#allocation6], %s900_s23, %s900_s23, %s901_s24  }
  0x14   :  { %s902_s27 = smov [#allocation2]   ;;  %s803_s11 = scalar_lea.hbm %s1073_s0, 256 }
  0x15   :  { %s24_s28 = sshll.u32 %s902_s27, 4  ;;  %p804_p8 = scmp.ne.s32.totalorder %s1073_s0, %s803_s11  ;;  %s25_s28 = int_to_ptr.vmem [resolvable:$true] %s24_s28 }
  0x16   :  { %p807_p9 = scmp.lt.u32.totalorder %s803_s11, %s1073_s0 }
  0x18   :  { %p809_p10 = pnand %p807_p9, %p804_p8 }
  0x1a   :  { %812 = shalt.err (!%p809_p10)
}
  0x1b   :  { %s813_s17 = scalar_lea.vmem %s25_s28, 256  ;;  %p818_p12 = scmp.lt.s32.totalorder %s25_s28, %s25_s28 }
  0x1c   :  { %p814_p11 = scmp.ne.s32.totalorder %s25_s28, %s813_s17  ;;  %p819_p13 = scmp.lt.s32.totalorder %s813_s17, %s813_s17 }
  0x1e   :  { %p820_p0 = por %p819_p13, %p818_p12 }
  0x20   :  { %p821_p1 = pnand %p820_p0, %p814_p11 }
  0x22   :  { %824 = shalt.err (!%p821_p1)
}
  0x23   :  { %s903_s1 = smov 128   ;;  %s904_s14 = smov 8  }
  0x24   :  { %30 = dma.hbm_to_vmem [thread:$0]  %s1073_s0, 256, %s25_s28, [#allocation3], %s903_s1, %s903_s1, %s904_s14  }
  0x25   :  { %s905_s20 = smov [#allocation7]   ;;  %s906_s22 = smov [#allocation8]  }
  0x26   :  { %s52_s21 = sshll.u32 %s905_s20, 4  ;;  %s66_s23 = sshll.u32 %s906_s22, 4  ;;  %s53_s21 = int_to_ptr.vmem [resolvable:$true] %s52_s21  ;;  %s991_s23 = int_to_ptr.vmem [resolvable:$true] %s66_s23 }
  0x27   :  { %s825_s26 = scalar_lea.hbm %s1077_s4, 2048 }
  0x28   :  { %p826_p2 = scmp.ne.s32.totalorder %s1077_s4, %s825_s26  ;;  %p829_p3 = scmp.lt.u32.totalorder %s825_s26, %s1077_s4 }
  0x2a   :  { %p831_p4 = pnand %p829_p3, %p826_p2 }
  0x2c   :  { %834 = shalt.err (!%p831_p4)
}
  0x2d   :  { %s835_s0 = scalar_lea.vmem %s53_s21, 2048  ;;  %p840_p6 = scmp.lt.s32.totalorder %s53_s21, %s53_s21 }
  0x2e   :  { %p836_p5 = scmp.ne.s32.totalorder %s53_s21, %s835_s0  ;;  %p841_p7 = scmp.lt.s32.totalorder %s835_s0, %s835_s0 }
  0x30   :  { %p842_p8 = por %p841_p7, %p840_p6 }
  0x32   :  { %p843_p9 = pnand %p842_p8, %p836_p5 }
  0x34   :  { %846 = shalt.err (!%p843_p9)
}
  0x35   :  { %58 = dma.hbm_to_vmem [thread:$0]  %s1077_s4, 2048, %s53_s21, [#allocation6], %s903_s1, %s903_s1, %s904_s14  }
  0x36   :  { %s847_s16 = scalar_lea.hbm %s1079_s6, 2048 }
  0x37   :  { %p848_p10 = scmp.ne.s32.totalorder %s1079_s6, %s847_s16  ;;  %p851_p11 = scmp.lt.u32.totalorder %s847_s16, %s1079_s6 }
  0x39   :  { %p853_p12 = pnand %p851_p11, %p848_p10 }
  0x3b   :  { %856 = shalt.err (!%p853_p12)
}
  0x3c   :  { %s857_s22 = scalar_lea.vmem %s991_s23, 2048  ;;  %p862_p0 = scmp.lt.s32.totalorder %s991_s23, %s991_s23 }
  0x3d   :  { %p858_p13 = scmp.ne.s32.totalorder %s991_s23, %s857_s22  ;;  %p863_p1 = scmp.lt.s32.totalorder %s857_s22, %s857_s22 }
  0x3f   :  { %p864_p2 = por %p863_p1, %p862_p0 }
  0x41   :  { %p865_p3 = pnand %p864_p2, %p858_p13 }
  0x43   :  { %868 = shalt.err (!%p865_p3)
}
  0x44   :  { %72 = dma.hbm_to_vmem [thread:$0]  %s1079_s6, 2048, %s991_s23, [#allocation9], %s903_s1, %s903_s1, %s904_s14  }
  0x45   :  { %891 = dma.done.wait [#allocation3], 256  }
  0x46   :  { %892 = vsyncadd [#allocation3], 4294967040 }
  0x47   :  { %893 = dma.done.wait [#allocation6], 6144  }
  0x48   :  { %894 = vsyncadd [#allocation6], 4294961152 }
  0x49   :  { %895 = dma.done.wait [#allocation9], 2048  }
  0x4a   :  { %896 = vsyncadd [#allocation9], 4294965248  ;;  %v907_v0 = vmov 0.0   ;;  %v94_v1 = vld [vmem:[#allocation5 + $0x8] sm:$0xff]  ;;  %v96_v2 = vld [vmem:[#allocation5 + $0x18] sm:$0xff]  ;;  %s908_s11 = smov [#allocation10]  }
  0x4b   :  { %201 = vmatprep.mubr.f32.mxu0 %v907_v0  ;;  %v93_v3 = vld [vmem:[#allocation5] sm:$0xff]  ;;  %v663_v4 = vpack.c.bf16 %v96_v2, %v94_v1  ;;  %v95_v5 = vld [vmem:[#allocation5 + $0x10] sm:$0xff]  ;;  %v98_v6 = vld [vmem:[#allocation5 + $0x28] sm:$0xff]  ;;  %s537_s0 = sshll.u32 %s908_s11, 4  ;;  %s538_s0 = int_to_ptr.vmem [resolvable:$true] %s537_s0 }
  0x4c   :  { %v100_v7 = vld [vmem:[#allocation5 + $0x38] sm:$0xff]  ;;  %v665_v8 = vpack.c.bf16 %v95_v5, %v93_v3  ;;  %v97_v10 = vld [vmem:[#allocation5 + $0x20] sm:$0xff]  ;;  %v99_v11 = vld [vmem:[#allocation5 + $0x30] sm:$0xff]  ;;  %s869_s28 = scalar_lea.vmem %s538_s0, 256  ;;  %p874_p5 = scmp.lt.s32.totalorder %s538_s0, %s538_s0 }
  0x4d   :  { %v667_v9 = vpack.c.bf16 %v100_v7, %v98_v6  ;;  %v102_v12 = vld [vmem:[#allocation5 + $0x48] sm:$0xff]  ;;  %664 = vmatprep.subr.bf16.mxu0 %v663_v4  ;;  %v104_v13 = vld [vmem:[#allocation5 + $0x58] sm:$0xff]  ;;  %v669_v14 = vpack.c.bf16 %v99_v11, %v97_v10  ;;  %v101_v16 = vld [vmem:[#allocation5 + $0x40] sm:$0xff]  ;;  %p870_p4 = scmp.ne.s32.totalorder %s538_s0, %s869_s28  ;;  %p875_p6 = scmp.lt.s32.totalorder %s869_s28, %s869_s28 }
  0x4e   :  { %666 = vmatpush1.bf16.msra.mxu0 %v665_v8  ;;  %v671_v15 = vpack.c.bf16 %v104_v13, %v102_v12  ;;  %v103_v17 = vld [vmem:[#allocation5 + $0x50] sm:$0xff]  ;;  %v106_v18 = vld [vmem:[#allocation5 + $0x68] sm:$0xff]  ;;  %v108_v19 = vld [vmem:[#allocation5 + $0x78] sm:$0xff] }
  0x4f   :  { %668 = vmatprep.subr.bf16.mxu0 %v667_v9  ;;  %v673_v20 = vpack.c.bf16 %v103_v17, %v101_v16  ;;  %v675_v21 = vpack.c.bf16 %v108_v19, %v106_v18  ;;  %v105_v22 = vld [vmem:[#allocation5 + $0x60] sm:$0xff]  ;;  %v107_v23 = vld [vmem:[#allocation5 + $0x70] sm:$0xff]  ;;  %v110_v24 = vld [vmem:[#allocation5 + $0x88] sm:$0xff]  ;;  %p876_p7 = por %p875_p6, %p874_p5 }
  0x50   :  { %v112_v25 = vld [vmem:[#allocation5 + $0x98] sm:$0xff]  ;;  %v677_v26 = vpack.c.bf16 %v107_v23, %v105_v22  ;;  %v109_v28 = vld [vmem:[#allocation5 + $0x80] sm:$0xff]  ;;  %v111_v29 = vld [vmem:[#allocation5 + $0x90] sm:$0xff] }
  0x51   :  { %v679_v27 = vpack.c.bf16 %v112_v25, %v110_v24  ;;  %v114_v30 = vld [vmem:[#allocation5 + $0xa8] sm:$0xff]  ;;  %v116_v31 = vld [vmem:[#allocation5 + $0xb8] sm:$0xff]  ;;  %v681_v32 = vpack.c.bf16 %v111_v29, %v109_v28  ;;  %v113_v34 = vld [vmem:[#allocation5 + $0xa0] sm:$0xff]  ;;  %p877_p8 = pnand %p876_p7, %p870_p4 }
  0x52   :  { %670 = vmatpush1.bf16.msra.mxu0 %v669_v14  ;;  %v683_v33 = vpack.c.bf16 %v116_v31, %v114_v30  ;;  %v115_v35 = vld [vmem:[#allocation5 + $0xb0] sm:$0xff]  ;;  %v118_v36 = vld [vmem:[#allocation5 + $0xc8] sm:$0xff]  ;;  %v120_v37 = vld [vmem:[#allocation5 + $0xd8] sm:$0xff] }
  0x53   :  { %672 = vmatprep.subr.bf16.mxu0 %v671_v15  ;;  %v685_v38 = vpack.c.bf16 %v115_v35, %v113_v34  ;;  %v687_v39 = vpack.c.bf16 %v120_v37, %v118_v36  ;;  %v117_v40 = vld [vmem:[#allocation5 + $0xc0] sm:$0xff]  ;;  %v119_v41 = vld [vmem:[#allocation5 + $0xd0] sm:$0xff]  ;;  %v122_v42 = vld [vmem:[#allocation5 + $0xe8] sm:$0xff] }
  0x54   :  { %v124_v43 = vld [vmem:[#allocation5 + $0xf8] sm:$0xff]  ;;  %v689_v44 = vpack.c.bf16 %v119_v41, %v117_v40  ;;  %v121_v46 = vld [vmem:[#allocation5 + $0xe0] sm:$0xff]  ;;  %v123_v47 = vld [vmem:[#allocation5 + $0xf0] sm:$0xff] }
  0x55   :  { %v691_v45 = vpack.c.bf16 %v124_v43, %v122_v42  ;;  %v693_v48 = vpack.c.bf16 %v123_v47, %v121_v46  ;;  %v1029_v49 = vld [vmem:[#allocation2] sm:$0xff]  ;;  %v1033_v50 = vld [vmem:[#allocation2 + $0x8] sm:$0xff]  ;;  %v281_v51 = vld [vmem:[#allocation7] sm:$0xff] }
  0x56   :  { %674 = vmatpush1.bf16.msra.mxu0 %v673_v20  ;;  %v282_v52 = vld [vmem:[#allocation7 + $0x8] sm:$0xff]  ;;  %v283_v54 = vld [vmem:[#allocation7 + $0x10] sm:$0xff]  ;;  %v284_v55 = vld [vmem:[#allocation7 + $0x18] sm:$0xff] }
  0x57   :  { %676 = vmatprep.subr.bf16.mxu0 %v675_v21  ;;  %v695_v53 = vpack.c.bf16 %v282_v52, %v281_v51  ;;  %v699_v56 = vpack.c.bf16 %v284_v55, %v283_v54  ;;  %v285_v57 = vld [vmem:[#allocation7 + $0x20] sm:$0xff]  ;;  %v286_v58 = vld [vmem:[#allocation7 + $0x28] sm:$0xff]  ;;  %v287_v60 = vld [vmem:[#allocation7 + $0x30] sm:$0xff] }
  0x58   :  { %v703_v59 = vpack.c.bf16 %v286_v58, %v285_v57  ;;  %v288_v61 = vld [vmem:[#allocation7 + $0x38] sm:$0xff]  ;;  %v289_v63 = vld [vmem:[#allocation7 + $0x40] sm:$0xff]  ;;  %v291_v2 = vld [vmem:[#allocation7 + $0x50] sm:$0xff] }
  0x59   :  { %696 = vmatprep.subr.bf16.mxu1 %v695_v53  ;;  %v707_v62 = vpack.c.bf16 %v288_v61, %v287_v60  ;;  %v292_v3 = vld [vmem:[#allocation7 + $0x58] sm:$0xff]  ;;  %v293_v4 = vld [vmem:[#allocation7 + $0x60] sm:$0xff]  ;;  %v294_v6 = vld [vmem:[#allocation7 + $0x68] sm:$0xff] }
  0x5a   :  { %678 = vmatpush1.bf16.msra.mxu0 %v677_v26  ;;  %698 = vmatpush3.bf16.msra.mxu1 %v695_v53  ;;  %v715_v5 = vpack.c.bf16 %v292_v3, %v291_v2  ;;  %v719_v7 = vpack.c.bf16 %v294_v6, %v293_v4  ;;  %v295_v8 = vld [vmem:[#allocation7 + $0x70] sm:$0xff]  ;;  %v296_v9 = vld [vmem:[#allocation7 + $0x78] sm:$0xff]  ;;  %v381_v11 = vld [vmem:[#allocation8] sm:$0xff] }
  0x5b   :  { %680 = vmatprep.subr.bf16.mxu0 %v679_v27  ;;  %700 = vmatprep.subr.bf16.mxu1 %v699_v56  ;;  %v723_v10 = vpack.c.bf16 %v296_v9, %v295_v8  ;;  %v382_v12 = vld [vmem:[#allocation8 + $0x8] sm:$0xff]  ;;  %v383_v13 = vld [vmem:[#allocation8 + $0x10] sm:$0xff]  ;;  %v384_v15 = vld [vmem:[#allocation8 + $0x18] sm:$0xff] }
  0x5c   :  { %v727_v14 = vpack.c.bf16 %v382_v12, %v381_v11  ;;  %v731_v16 = vpack.c.bf16 %v384_v15, %v383_v13  ;;  %v385_v17 = vld [vmem:[#allocation8 + $0x20] sm:$0xff]  ;;  %v386_v18 = vld [vmem:[#allocation8 + $0x28] sm:$0xff]  ;;  %v387_v20 = vld [vmem:[#allocation8 + $0x30] sm:$0xff] }
  0x5d   :  { %v735_v19 = vpack.c.bf16 %v386_v18, %v385_v17  ;;  %v388_v21 = vld [vmem:[#allocation8 + $0x38] sm:$0xff]  ;;  %v389_v23 = vld [vmem:[#allocation8 + $0x40] sm:$0xff]  ;;  %v390_v24 = vld [vmem:[#allocation8 + $0x48] sm:$0xff] }
  0x5e   :  { %682 = vmatpush1.bf16.msra.mxu0 %v681_v32  ;;  %702 = vmatpush3.bf16.msra.mxu1 %v699_v56  ;;  %v739_v22 = vpack.c.bf16 %v388_v21, %v387_v20  ;;  %v743_v25 = vpack.c.bf16 %v390_v24, %v389_v23  ;;  %v391_v26 = vld [vmem:[#allocation8 + $0x50] sm:$0xff]  ;;  %v392_v27 = vld [vmem:[#allocation8 + $0x58] sm:$0xff]  ;;  %v393_v29 = vld [vmem:[#allocation8 + $0x60] sm:$0xff]  ;;  %v127_v32 = vlaneseq }
  0x5f   :  { %684 = vmatprep.subr.bf16.mxu0 %v683_v33  ;;  %704 = vmatprep.subr.bf16.mxu1 %v703_v59  ;;  %v747_v28 = vpack.c.bf16 %v392_v27, %v391_v26  ;;  %v394_v30 = vld [vmem:[#allocation8 + $0x68] sm:$0xff]  ;;  %v125_v35 = vld [vmem:[%s1075_s2] sm:$0x3]  ;;  %v396_v27 = vld [vmem:[#allocation8 + $0x78] sm:$0xff] }
  0x60   :  { %v751_v31 = vpack.c.bf16 %v394_v30, %v393_v29  ;;  %v128_v33 = vshrl.u32 %v127_v32, 7  ;;  %v228_v56 = vld [vmem:[%s1076_s3] sm:$0x7] }
  0x61   :  { %v395_v26 = vld [vmem:[#allocation8 + $0x70] sm:$0xff] }
  0x62   :  { %686 = vmatpush1.bf16.msra.mxu0 %v685_v38  ;;  %706 = vmatpush3.bf16.msra.mxu1 %v703_v59  ;;  %v133_v34 = vsub.s32 1, %v128_v33  ;;  %v242_v57 = vadd.s32 4294967295, %v128_v33  ;;  %v263_v58 = vadd.s32 1, %v128_v33  ;;  %v273_v61 = vsub.s32 2, %v128_v33  ;;  %v553_v29 = vld [vmem:[%s1078_s5] ss:$0 sm:$0xff] }
  0x63   :  { %688 = vmatprep.subr.bf16.mxu0 %v687_v39  ;;  %708 = vmatprep.subr.bf16.mxu1 %v707_v62  ;;  %vm239_vm0 = vcmp.lt.s32.totalorder %v128_v33, 1  ;;  %vm260_vm2 = vcmp.lt.s32.totalorder %v128_v33, 7 }
  0x64   :  { %v134_v36 = vrot.slane %v125_v35, %v133_v34  ;;  %vm243_vm1 = vcmp.ge.s32.totalorder %v242_v57, 0  ;;  %vm265_vm3 = vcmp.lt.s32.totalorder %v263_v58, 8 }
  0x66   :  { %690 = vmatpush1.bf16.msra.mxu0 %v689_v44  ;;  %710 = vmatpush3.bf16.msra.mxu1 %v707_v62 }
  0x67   :  { %692 = vmatprep.subr.bf16.mxu0 %v691_v45 }
  0x6a   :  { %694 = vmatpush1.bf16.msra.mxu0 %v693_v48  ;;  %v129_v48 = vsub.s32 0, %v128_v33 }
  0x6b   :  { %728 = vmatprep.subr.bf16.mxu0 %v727_v14 }
  0x6c   :  { %v130_v52 = vrot.slane %v125_v35, %v129_v48  ;;  %v253_v62 = vrot.slane %v228_v56, %v129_v48 }
  0x6d   :  { %202 = vmatmul.mubr.f32.vlgmr.msra.gmra.mrb[0].mxu0 %v1029_v49 }
  0x6e   :  { %207 = vmatprep.mubr.f32.mxu0 %v907_v0  ;;  %v290_v0 = vld [vmem:[#allocation7 + $0x48] sm:$0xff]  ;;  %730 = vmatpush3.bf16.msra.mxu0 %v727_v14 }
  0x6f   :  { %v711_v1 = vpack.c.bf16 %v290_v0, %v289_v63  ;;  %732 = vmatprep.subr.bf16.mxu0 %v731_v16  ;;  %v234_v63 = vrot.slane %v228_v56, %v133_v34 }
  0x71   :  { %208 = vmatmul.mubr.f32.gmra.mrb[2].mxu0 %v1033_v50  ;;  %712 = vmatprep.subr.bf16.mxu1 %v711_v1 }
  0x72   :  { %714 = vmatpush3.bf16.msra.mxu1 %v711_v1  ;;  %734 = vmatpush3.bf16.msra.mxu0 %v731_v16 }
  0x73   :  { %716 = vmatprep.subr.bf16.mxu1 %v715_v5  ;;  %736 = vmatprep.subr.bf16.mxu0 %v735_v19 }
  0x76   :  { %718 = vmatpush3.bf16.msra.mxu1 %v715_v5  ;;  %738 = vmatpush3.bf16.msra.mxu0 %v735_v19  ;;  %v274_v5 = vrot.slane %v228_v56, %v273_v61  ;;  %v555_v61 = vld [vmem:[%s1081_s8] ss:$0 sm:$0xff] }
  0x77   :  { %720 = vmatprep.subr.bf16.mxu1 %v719_v7  ;;  %740 = vmatprep.subr.bf16.mxu0 %v739_v22 }
  0x7a   :  { %722 = vmatpush3.bf16.msra.mxu1 %v719_v7  ;;  %742 = vmatpush3.bf16.msra.mxu0 %v739_v22 }
  0x7b   :  { %724 = vmatprep.subr.bf16.mxu1 %v723_v10  ;;  %744 = vmatprep.subr.bf16.mxu0 %v743_v25 }
  0x7e   :  { %726 = vmatpush3.bf16.msra.mxu1 %v723_v10  ;;  %746 = vmatpush3.bf16.msra.mxu0 %v743_v25 }
  0x7f   :  { %748 = vmatprep.subr.bf16.mxu0 %v747_v28 }
  0x82   :  { %750 = vmatpush3.bf16.msra.mxu0 %v747_v28  ;;  %v755_v28 = vpack.c.bf16 %v396_v27, %v395_v26 }
  0x83   :  { %752 = vmatprep.subr.bf16.mxu0 %v751_v31 }
  0x86   :  { %754 = vmatpush3.bf16.msra.mxu0 %v751_v31 }
  0x87   :  { %756 = vmatprep.subr.bf16.mxu0 %v755_v28 }
  0x8a   :  { %758 = vmatpush3.bf16.msra.mxu0 %v755_v28 }
 0x140   :  { %v203_v37 = vpop.f32.mrb[0].mxu0 }
 0x141   :  { %v205_v38 = vpop.f32.mrb[1].mxu0  ;;  %v204_v53 = vadd.f32 %v203_v37, %v130_v52  ;;  %v554_v37 = vld [vmem:[%s1080_s7] ss:$0 sm:$0xff] }
 0x142   :  { %v206_v39 = vadd.f32 %v205_v38, %v134_v36 }
 0x144   :  { %v551_v40 = vmul.f32 -1.442695, %v206_v39  ;;  %v209_v41 = vpop.f32.mrb[2].mxu0 }
 0x145   :  { %v211_v42 = vpop.f32.mrb[3].mxu0  ;;  %v210_v59 = vadd.f32 %v209_v41, %v130_v52 }
 0x146   :  { %769 = vpow2.f32 %v551_v40  ;;  %v212_v43 = vadd.f32 %v211_v42, %v134_v36  ;;  %v492_v42 = vand.u32 127, %v127_v32 }
 0x148   :  { %v552_v44 = vmul.f32 -1.442695, %v212_v43  ;;  %vm493_vm4 = vcmp.lt.s32.totalorder %v492_v42, 32 }
 0x14a   :  { %771 = vpow2.f32 %v552_v44 }
 0x150   :  { %v770_v45 = vpop.eup %769 }
 0x151   :  { %v220_v46 = vadd.f32 1.0, %v770_v45 }
 0x153   :  { %773 = vrcp.f32 %v220_v46 }
 0x154   :  { %v772_v47 = vpop.eup %771 }
 0x155   :  { %v221_v51 = vadd.f32 1.0, %v772_v47 }
 0x157   :  { %775 = vrcp.f32 %v221_v51 }
 0x15d   :  { %v774_v54 = vpop.eup %773 }
 0x15e   :  { %v226_v55 = vmul.f32 %v774_v54, %v204_v53 }
 0x160   :  { %v237_v1 = vrot.slane %v226_v55, 7  ;;  %v258_v3 = vrot.slane %v226_v55, 1  ;;  %v235_v14 = vmul.f32 %v234_v63, %v226_v55 }
 0x161   :  { %v776_v60 = vpop.eup %775 }
 0x162   :  { %v227_v0 = vmul.f32 %v776_v60, %v210_v59 }
 0x164   :  { %v238_v2 = vrot.slane %v227_v0, 7  ;;  %v259_v4 = vrot.slane %v227_v0, 1  ;;  %v236_v16 = vmul.f32 %v234_v63, %v227_v0  ;;  %v556_v63 = vld [vmem:[%s1082_s9] ss:$0 sm:$0xff] }
 0x166   :  { %v240_v6 = vsel %vm239_vm0, %v237_v1, %v238_v2  ;;  %v241_v7 = vsel %vm239_vm0, %v238_v2, %v237_v1  ;;  %v261_v8 = vsel %vm260_vm2, %v258_v3, %v259_v4  ;;  %v262_v9 = vsel %vm260_vm2, %v259_v4, %v258_v3 }
 0x167   :  { %v248_v10 = vsel %vm243_vm1, %v241_v7, 0.0  ;;  %v249_v11 = vsel %vm243_vm1, %v240_v6, 0.0  ;;  %v269_v12 = vsel %vm265_vm3, %v261_v8, 0.0  ;;  %v270_v13 = vsel %vm265_vm3, %v262_v9, 0.0 }
 0x168   :  { %v254_v15 = vmul.f32 %v253_v62, %v248_v10  ;;  %v255_v17 = vmul.f32 %v253_v62, %v249_v11  ;;  %v275_v19 = vmul.f32 %v274_v5, %v269_v12  ;;  %v276_v21 = vmul.f32 %v274_v5, %v270_v13 }
 0x16a   :  { %v256_v18 = vadd.f32 %v254_v15, %v235_v14  ;;  %v257_v20 = vadd.f32 %v255_v17, %v236_v16 }
 0x16c   :  { %v277_v22 = vadd.f32 %v275_v19, %v256_v18  ;;  %v278_v23 = vadd.f32 %v276_v21, %v257_v20 }
 0x16e   :  { %v279_v24 = vadd.f32 %v277_v22, %v1029_v49  ;;  %v280_v25 = vadd.f32 %v278_v23, %v1033_v50 }
 0x170   :  { %625 = vmatprep.mubr.f32.mxu1 %v279_v24 }
 0x171   :  { %626 = vmatmul.mubr.f32.vlgmr.msra.gmra.mrb[0].mxu1 %v280_v25 }
 0x244   :  { %v627_v30 = vpop.f32.mrb[0].mxu1 }
 0x245   :  { %v376_v31 = vadd.f32 %v627_v30, %v553_v29  ;;  %v370_v33 = vpop.f32.mrb[1].mxu1 }
 0x246   :  { %v371_v34 = vadd.f32 %v553_v29, %v370_v33 }
 0x247   :  { %v380_v36 = vmax.f32 %v376_v31, 0.0 }
 0x248   :  { %v379_v35 = vmax.f32 %v371_v34, 0.0 }
 0x24a   :  { %660 = vmatprep.mubr.f32.mxu0 %v379_v35 }
 0x24b   :  { %661 = vmatmul.mubr.f32.vlgmr.msra.gmra.mrb[4].mxu0 %v380_v36 }
 0x31e   :  { %v662_v49 = vpop.f32.mrb[4].mxu0 }
 0x31f   :  { %v463_v50 = vpop.f32.mrb[5].mxu0  ;;  %v473_v39 = vadd.f32 %v662_v49, %v280_v25 }
 0x320   :  { %v472_v38 = vadd.f32 %v463_v50, %v279_v24 }
 0x321   :  { %v482_v41 = vadd.f32 %v554_v37, %v473_v39 }
 0x322   :  { %v481_v40 = vadd.f32 %v554_v37, %v472_v38 }
 0x324   :  { %483 = vadd.xlane.f32.xlu0 %v481_v40 }
 0x328   :  { %485 = vadd.xlane.f32.xlu0 %v482_v41 }
 0x3b1   :  { %v484_v43 = vpop.xlane.xlu0 %483 }
 0x3b2   :  { %v487_v44 = vmul.f32 0.03125, %v484_v43 }
 0x3b4   :  { %v489_v45 = vsub.f32 %v481_v40, %v487_v44 }
 0x3b5   :  { %v486_v46 = vpop.xlane.xlu0 %485 }
 0x3b6   :  { %v488_v47 = vmul.f32 0.03125, %v486_v46  ;;  %v496_v48 = vsel %vm493_vm4, %v489_v45, 0.0 }
 0x3b7   :  { %v498_v51 = vmul.f32 %v496_v48, %v496_v48 }
 0x3b8   :  { %v490_v52 = vsub.f32 %v482_v41, %v488_v47 }
 0x3b9   :  { %500 = vadd.xlane.f32.xlu1 %v498_v51 }
 0x3ba   :  { %v497_v53 = vsel %vm493_vm4, %v490_v52, 0.0 }
 0x3bb   :  { %v499_v54 = vmul.f32 %v497_v53, %v497_v53 }
 0x3bd   :  { %502 = vadd.xlane.f32.xlu1 %v499_v54 }
 0x446   :  { %v501_v55 = vpop.xlane.xlu1 %500 }
 0x447   :  { %v504_v56 = vmul.f32 0.03125, %v501_v55 }
 0x449   :  { %v506_v57 = vadd.f32 1e-05, %v504_v56 }
 0x44a   :  { %v503_v58 = vpop.xlane.xlu1 %502 }
 0x44b   :  { %777 = vrsqrt.f32 %v506_v57  ;;  %v505_v59 = vmul.f32 0.03125, %v503_v58 }
 0x44d   :  { %v507_v32 = vadd.f32 1e-05, %v505_v59 }
 0x44f   :  { %779 = vrsqrt.f32 %v507_v32 }
 0x455   :  { %v778_v60 = vpop.eup %777 }
 0x456   :  { %v510_v62 = vmul.f32 %v778_v60, %v489_v45 }
 0x458   :  { %v519_v0 = vmul.f32 %v555_v61, %v510_v62 }
 0x459   :  { %v780_v1 = vpop.eup %779 }
 0x45a   :  { %v511_v2 = vmul.f32 %v780_v1, %v490_v52  ;;  %v528_v3 = vadd.f32 %v556_v63, %v519_v0 }
 0x45c   :  { %v520_v4 = vmul.f32 %v555_v61, %v511_v2  ;;  %530 = vst [vmem:[#allocation10] sm:$0xff] %v528_v3 }
 0x45e   :  { %v529_v5 = vadd.f32 %v556_v63, %v520_v4 }
 0x460   :  { %531 = vst [vmem:[#allocation10 + $0x8] sm:$0xff] %v529_v5 }
 0x461   :  { %880 = shalt.err (!%p877_p8)
}
 0x462   :  { %s881_s12 = scalar_lea.hbm %s1083_s10, 256 }
 0x463   :  { %p882_p9 = scmp.ne.s32.totalorder %s1083_s10, %s881_s12  ;;  %p885_p10 = scmp.lt.u32.totalorder %s881_s12, %s1083_s10 }
 0x465   :  { %p887_p11 = pnand %p885_p10, %p882_p9 }
 0x467   :  { %890 = shalt.err (!%p887_p11)
}
 0x468   :  { %543 = dma.vmem_to_hbm [thread:$0]  %s538_s0, 256, %s1083_s10, [#allocation4], %s903_s1, %s903_s1, %s904_s14  }
 0x469   :  { %897 = dma.done.wait [#allocation4], 256  }
 0x46a   :  { %898 = vsyncadd [#allocation4], 4294967040 }
 0x46b   :  { %547 = vsyncpa [#allocation3], 1 }
 0x46c   :  { %548 = vsyncpa [#allocation6], 1 }
 0x46d   :  { %549 = vsyncpa [#allocation9], 1 }
 0x46e   :  { %550 = vsyncpa [#allocation4], 1 }

// kernel: tpu_custom_call.1
= control target key start
LH: loop header
LB: loop body
LE: loop exit
PB: predicated region body
PF: predicated region fallthrough
CT: control target
= control target key end

     0   :  { %15 = vsyncpa [#allocation3], 0  ;;  %s1073_s0 = inlined_call_operand.hbm [shape: f32[2,8,128], index: 0, kind: input, shape index: {}]   ;;  %s1074_s1 = inlined_call_operand.hbm [shape: f32[128,256], index: 1, kind: input, shape index: {}]   ;;  %s1075_s2 = inlined_call_operand.vmem [shape: f32[1,256], index: 2, kind: input, shape index: {}]   ;;  %s1076_s3 = inlined_call_operand.vmem [shape: f32[3,128], index: 3, kind: input, shape index: {}]   ;;  %s1077_s4 = inlined_call_operand.hbm [shape: f32[128,128], index: 4, kind: input, shape index: {}]   ;;  %s1078_s5 = inlined_call_operand.vmem [shape: f32[1,128], index: 5, kind: input, shape index: {}]   ;;  %s1079_s6 = inlined_call_operand.hbm [shape: f32[128,128], index: 6, kind: input, shape index: {}]   ;;  %s1080_s7 = inlined_call_operand.vmem [shape: f32[1,128], index: 7, kind: input, shape index: {}]   ;;  %s1081_s8 = inlined_call_operand.vmem [shape: f32[1,128], index: 8, kind: input, shape index: {}]   ;;  %s1082_s9 = inlined_call_operand.vmem [shape: f32[1,128], index: 9, kind: input, shape index: {}]   ;;  %s1083_s10 = inlined_call_operand.hbm [shape: f32[2,8,128], index: 10, kind: output, shape index: {}]  }
   0x1   :  { %16 = vsyncpa [#allocation6], 0 }
   0x2   :  { %17 = vsyncpa [#allocation9], 0 }
   0x3   :  { %18 = vsyncpa [#allocation4], 0  ;;  %s899_s13 = smov [#allocation5]   ;;  %s781_s17 = scalar_lea.hbm %s1074_s1, 4096 }
   0x4   :  { %s36_s14 = sshll.u32 %s899_s13, 4  ;;  %p782_p0 = scmp.ne.s32.totalorder %s1074_s1, %s781_s17  ;;  %s37_s14 = int_to_ptr.vmem [resolvable:$true] %s36_s14 }
   0x5   :  { %p785_p1 = scmp.lt.u32.totalorder %s781_s17, %s1074_s1 }
   0x7   :  { %p787_p2 = pnand %p785_p1, %p782_p0 }
   0x9   :  { %790 = shalt.err (!%p787_p2)
}
   0xa   :  { %s791_s22 = scalar_lea.vmem %s37_s14, 4096  ;;  %p796_p4 = scmp.lt.s32.totalorder %s37_s14, %s37_s14 }
   0xb   :  { %p792_p3 = scmp.ne.s32.totalorder %s37_s14, %s791_s22  ;;  %p797_p5 = scmp.lt.s32.totalorder %s791_s22, %s791_s22 }
   0xd   :  { %p798_p6 = por %p797_p5, %p796_p4 }
   0xf   :  { %p799_p7 = pnand %p798_p6, %p792_p3 }
  0x11   :  { %802 = shalt.err (!%p799_p7)
}
  0x12   :  { %s900_s23 = smov 256   ;;  %s901_s24 = smov 16  }
  0x13   :  { %42 = dma.hbm_to_vmem [thread:$0]  %s1074_s1, 4096, %s37_s14, [#allocation6], %s900_s23, %s900_s23, %s901_s24  }
  0x14   :  { %s902_s27 = smov [#allocation2]   ;;  %s803_s11 = scalar_lea.hbm %s1073_s0, 256 }
  0x15   :  { %s24_s28 = sshll.u32 %s902_s27, 4  ;;  %p804_p8 = scmp.ne.s32.totalorder %s1073_s0, %s803_s11  ;;  %s25_s28 = int_to_ptr.vmem [resolvable:$true] %s24_s28 }
  0x16   :  { %p807_p9 = scmp.lt.u32.totalorder %s803_s11, %s1073_s0 }
  0x18   :  { %p809_p10 = pnand %p807_p9, %p804_p8 }
  0x1a   :  { %812 = shalt.err (!%p809_p10)
}
  0x1b   :  { %s813_s17 = scalar_lea.vmem %s25_s28, 256  ;;  %p818_p12 = scmp.lt.s32.totalorder %s25_s28, %s25_s28 }
  0x1c   :  { %p814_p11 = scmp.ne.s32.totalorder %s25_s28, %s813_s17  ;;  %p819_p13 = scmp.lt.s32.totalorder %s813_s17, %s813_s17 }
  0x1e   :  { %p820_p0 = por %p819_p13, %p818_p12 }
  0x20   :  { %p821_p1 = pnand %p820_p0, %p814_p11 }
  0x22   :  { %824 = shalt.err (!%p821_p1)
}
  0x23   :  { %s903_s1 = smov 128   ;;  %s904_s14 = smov 8  }
  0x24   :  { %30 = dma.hbm_to_vmem [thread:$0]  %s1073_s0, 256, %s25_s28, [#allocation3], %s903_s1, %s903_s1, %s904_s14  }
  0x25   :  { %s905_s20 = smov [#allocation7]   ;;  %s906_s22 = smov [#allocation8]  }
  0x26   :  { %s52_s21 = sshll.u32 %s905_s20, 4  ;;  %s66_s23 = sshll.u32 %s906_s22, 4  ;;  %s53_s21 = int_to_ptr.vmem [resolvable:$true] %s52_s21  ;;  %s991_s23 = int_to_ptr.vmem [resolvable:$true] %s66_s23 }
  0x27   :  { %s825_s26 = scalar_lea.hbm %s1077_s4, 2048 }
  0x28   :  { %p826_p2 = scmp.ne.s32.totalorder %s1077_s4, %s825_s26  ;;  %p829_p3 = scmp.lt.u32.totalorder %s825_s26, %s1077_s4 }
  0x2a   :  { %p831_p4 = pnand %p829_p3, %p826_p2 }
  0x2c   :  { %834 = shalt.err (!%p831_p4)
}
  0x2d   :  { %s835_s0 = scalar_lea.vmem %s53_s21, 2048  ;;  %p840_p6 = scmp.lt.s32.totalorder %s53_s21, %s53_s21 }
  0x2e   :  { %p836_p5 = scmp.ne.s32.totalorder %s53_s21, %s835_s0  ;;  %p841_p7 = scmp.lt.s32.totalorder %s835_s0, %s835_s0 }
  0x30   :  { %p842_p8 = por %p841_p7, %p840_p6 }
  0x32   :  { %p843_p9 = pnand %p842_p8, %p836_p5 }
  0x34   :  { %846 = shalt.err (!%p843_p9)
}
  0x35   :  { %58 = dma.hbm_to_vmem [thread:$0]  %s1077_s4, 2048, %s53_s21, [#allocation6], %s903_s1, %s903_s1, %s904_s14  }
  0x36   :  { %s847_s16 = scalar_lea.hbm %s1079_s6, 2048 }
  0x37   :  { %p848_p10 = scmp.ne.s32.totalorder %s1079_s6, %s847_s16  ;;  %p851_p11 = scmp.lt.u32.totalorder %s847_s16, %s1079_s6 }
  0x39   :  { %p853_p12 = pnand %p851_p11, %p848_p10 }
  0x3b   :  { %856 = shalt.err (!%p853_p12)
}
  0x3c   :  { %s857_s22 = scalar_lea.vmem %s991_s23, 2048  ;;  %p862_p0 = scmp.lt.s32.totalorder %s991_s23, %s991_s23 }
  0x3d   :  { %p858_p13 = scmp.ne.s32.totalorder %s991_s23, %s857_s22  ;;  %p863_p1 = scmp.lt.s32.totalorder %s857_s22, %s857_s22 }
  0x3f   :  { %p864_p2 = por %p863_p1, %p862_p0 }
  0x41   :  { %p865_p3 = pnand %p864_p2, %p858_p13 }
  0x43   :  { %868 = shalt.err (!%p865_p3)
}
  0x44   :  { %72 = dma.hbm_to_vmem [thread:$0]  %s1079_s6, 2048, %s991_s23, [#allocation9], %s903_s1, %s903_s1, %s904_s14  }
  0x45   :  { %891 = dma.done.wait [#allocation3], 256  }
  0x46   :  { %892 = vsyncadd [#allocation3], 4294967040 }
  0x47   :  { %893 = dma.done.wait [#allocation6], 6144  }
  0x48   :  { %894 = vsyncadd [#allocation6], 4294961152 }
  0x49   :  { %895 = dma.done.wait [#allocation9], 2048  }
  0x4a   :  { %896 = vsyncadd [#allocation9], 4294965248  ;;  %v907_v0 = vmov 0.0   ;;  %v94_v1 = vld [vmem:[#allocation5 + $0x8] sm:$0xff]  ;;  %v96_v2 = vld [vmem:[#allocation5 + $0x18] sm:$0xff]  ;;  %s908_s11 = smov [#allocation10]  }
  0x4b   :  { %201 = vmatprep.mubr.f32.mxu0 %v907_v0  ;;  %v93_v3 = vld [vmem:[#allocation5] sm:$0xff]  ;;  %v663_v4 = vpack.c.bf16 %v96_v2, %v94_v1  ;;  %v95_v5 = vld [vmem:[#allocation5 + $0x10] sm:$0xff]  ;;  %v98_v6 = vld [vmem:[#allocation5 + $0x28] sm:$0xff]  ;;  %s537_s0 = sshll.u32 %s908_s11, 4  ;;  %s538_s0 = int_to_ptr.vmem [resolvable:$true] %s537_s0 }
  0x4c   :  { %v100_v7 = vld [vmem:[#allocation5 + $0x38] sm:$0xff]  ;;  %v665_v8 = vpack.c.bf16 %v95_v5, %v93_v3  ;;  %v97_v10 = vld [vmem:[#allocation5 + $0x20] sm:$0xff]  ;;  %v99_v11 = vld [vmem:[#allocation5 + $0x30] sm:$0xff]  ;;  %s869_s28 = scalar_lea.vmem %s538_s0, 256  ;;  %p874_p5 = scmp.lt.s32.totalorder %s538_s0, %s538_s0 }
  0x4d   :  { %v667_v9 = vpack.c.bf16 %v100_v7, %v98_v6  ;;  %v102_v12 = vld [vmem:[#allocation5 + $0x48] sm:$0xff]  ;;  %664 = vmatprep.subr.bf16.mxu0 %v663_v4  ;;  %v104_v13 = vld [vmem:[#allocation5 + $0x58] sm:$0xff]  ;;  %v669_v14 = vpack.c.bf16 %v99_v11, %v97_v10  ;;  %v101_v16 = vld [vmem:[#allocation5 + $0x40] sm:$0xff]  ;;  %p870_p4 = scmp.ne.s32.totalorder %s538_s0, %s869_s28  ;;  %p875_p6 = scmp.lt.s32.totalorder %s869_s28, %s869_s28 }
  0x4e   :  { %666 = vmatpush1.bf16.msra.mxu0 %v665_v8  ;;  %v671_v15 = vpack.c.bf16 %v104_v13, %v102_v12  ;;  %v103_v17 = vld [vmem:[#allocation5 + $0x50] sm:$0xff]  ;;  %v106_v18 = vld [vmem:[#allocation5 + $0x68] sm:$0xff]  ;;  %v108_v19 = vld [vmem:[#allocation5 + $0x78] sm:$0xff] }
  0x4f   :  { %668 = vmatprep.subr.bf16.mxu0 %v667_v9  ;;  %v673_v20 = vpack.c.bf16 %v103_v17, %v101_v16  ;;  %v675_v21 = vpack.c.bf16 %v108_v19, %v106_v18  ;;  %v105_v22 = vld [vmem:[#allocation5 + $0x60] sm:$0xff]  ;;  %v107_v23 = vld [vmem:[#allocation5 + $0x70] sm:$0xff]  ;;  %v110_v24 = vld [vmem:[#allocation5 + $0x88] sm:$0xff]  ;;  %p876_p7 = por %p875_p6, %p874_p5 }
  0x50   :  { %v112_v25 = vld [vmem:[#allocation5 + $0x98] sm:$0xff]  ;;  %v677_v26 = vpack.c.bf16 %v107_v23, %v105_v22  ;;  %v109_v28 = vld [vmem:[#allocation5 + $0x80] sm:$0xff]  ;;  %v111_v29 = vld [vmem:[#allocation5 + $0x90] sm:$0xff] }
  0x51   :  { %v679_v27 = vpack.c.bf16 %v112_v25, %v110_v24  ;;  %v114_v30 = vld [vmem:[#allocation5 + $0xa8] sm:$0xff]  ;;  %v116_v31 = vld [vmem:[#allocation5 + $0xb8] sm:$0xff]  ;;  %v681_v32 = vpack.c.bf16 %v111_v29, %v109_v28  ;;  %v113_v34 = vld [vmem:[#allocation5 + $0xa0] sm:$0xff]  ;;  %p877_p8 = pnand %p876_p7, %p870_p4 }
  0x52   :  { %670 = vmatpush1.bf16.msra.mxu0 %v669_v14  ;;  %v683_v33 = vpack.c.bf16 %v116_v31, %v114_v30  ;;  %v115_v35 = vld [vmem:[#allocation5 + $0xb0] sm:$0xff]  ;;  %v118_v36 = vld [vmem:[#allocation5 + $0xc8] sm:$0xff]  ;;  %v120_v37 = vld [vmem:[#allocation5 + $0xd8] sm:$0xff] }
  0x53   :  { %672 = vmatprep.subr.bf16.mxu0 %v671_v15  ;;  %v685_v38 = vpack.c.bf16 %v115_v35, %v113_v34  ;;  %v687_v39 = vpack.c.bf16 %v120_v37, %v118_v36  ;;  %v117_v40 = vld [vmem:[#allocation5 + $0xc0] sm:$0xff]  ;;  %v119_v41 = vld [vmem:[#allocation5 + $0xd0] sm:$0xff]  ;;  %v122_v42 = vld [vmem:[#allocation5 + $0xe8] sm:$0xff] }
  0x54   :  { %v124_v43 = vld [vmem:[#allocation5 + $0xf8] sm:$0xff]  ;;  %v689_v44 = vpack.c.bf16 %v119_v41, %v117_v40  ;;  %v121_v46 = vld [vmem:[#allocation5 + $0xe0] sm:$0xff]  ;;  %v123_v47 = vld [vmem:[#allocation5 + $0xf0] sm:$0xff] }
  0x55   :  { %v691_v45 = vpack.c.bf16 %v124_v43, %v122_v42  ;;  %v693_v48 = vpack.c.bf16 %v123_v47, %v121_v46  ;;  %v1029_v49 = vld [vmem:[#allocation2] sm:$0xff]  ;;  %v1033_v50 = vld [vmem:[#allocation2 + $0x8] sm:$0xff]  ;;  %v281_v51 = vld [vmem:[#allocation7] sm:$0xff] }
  0x56   :  { %674 = vmatpush1.bf16.msra.mxu0 %v673_v20  ;;  %v282_v52 = vld [vmem:[#allocation7 + $0x8] sm:$0xff]  ;;  %v283_v54 = vld [vmem:[#allocation7 + $0x10] sm:$0xff]  ;;  %v284_v55 = vld [vmem:[#allocation7 + $0x18] sm:$0xff] }
  0x57   :  { %676 = vmatprep.subr.bf16.mxu0 %v675_v21  ;;  %v695_v53 = vpack.c.bf16 %v282_v52, %v281_v51  ;;  %v699_v56 = vpack.c.bf16 %v284_v55, %v283_v54  ;;  %v285_v57 = vld [vmem:[#allocation7 + $0x20] sm:$0xff]  ;;  %v286_v58 = vld [vmem:[#allocation7 + $0x28] sm:$0xff]  ;;  %v287_v60 = vld [vmem:[#allocation7 + $0x30] sm:$0xff] }
  0x58   :  { %v703_v59 = vpack.c.bf16 %v286_v58, %v285_v57  ;;  %v288_v61 = vld [vmem:[#allocation7 + $0x38] sm:$0xff]  ;;  %v289_v63 = vld [vmem:[#allocation7 + $0x40] sm:$0xff]  ;;  %v291_v2 = vld [vmem:[#allocation7 + $0x50] sm:$0xff] }
  0x59   :  { %696 = vmatprep.subr.bf16.mxu1 %v695_v53  ;;  %v707_v62 = vpack.c.bf16 %v288_v61, %v287_v60  ;;  %v292_v3 = vld [vmem:[#allocation7 + $0x58] sm:$0xff]  ;;  %v293_v4 = vld [vmem:[#allocation7 + $0x60] sm:$0xff]  ;;  %v294_v6 = vld [vmem:[#allocation7 + $0x68] sm:$0xff] }
  0x5a   :  { %678 = vmatpush1.bf16.msra.mxu0 %v677_v26  ;;  %698 = vmatpush3.bf16.msra.mxu1 %v695_v53  ;;  %v715_v5 = vpack.c.bf16 %v292_v3, %v291_v2  ;;  %v719_v7 = vpack.c.bf16 %v294_v6, %v293_v4  ;;  %v295_v8 = vld [vmem:[#allocation7 + $0x70] sm:$0xff]  ;;  %v296_v9 = vld [vmem:[#allocation7 + $0x78] sm:$0xff]  ;;  %v381_v11 = vld [vmem:[#allocation8] sm:$0xff] }
  0x5b   :  { %680 = vmatprep.subr.bf16.mxu0 %v679_v27  ;;  %700 = vmatprep.subr.bf16.mxu1 %v699_v56  ;;  %v723_v10 = vpack.c.bf16 %v296_v9, %v295_v8  ;;  %v382_v12 = vld [vmem:[#allocation8 + $0x8] sm:$0xff]  ;;  %v383_v13 = vld [vmem:[#allocation8 + $0x10] sm:$0xff]  ;;  %v384_v15 = vld [vmem:[#allocation8 + $0x18] sm:$0xff] }
  0x5c   :  { %v727_v14 = vpack.c.bf16 %v382_v12, %v381_v11  ;;  %v731_v16 = vpack.c.bf16 %v384_v15, %v383_v13  ;;  %v385_v17 = vld [vmem:[#allocation8 + $0x20] sm:$0xff]  ;;  %v386_v18 = vld [vmem:[#allocation8 + $0x28] sm:$0xff]  ;;  %v387_v20 = vld [vmem:[#allocation8 + $0x30] sm:$0xff] }
  0x5d   :  { %v735_v19 = vpack.c.bf16 %v386_v18, %v385_v17  ;;  %v388_v21 = vld [vmem:[#allocation8 + $0x38] sm:$0xff]  ;;  %v389_v23 = vld [vmem:[#allocation8 + $0x40] sm:$0xff]  ;;  %v390_v24 = vld [vmem:[#allocation8 + $0x48] sm:$0xff] }
  0x5e   :  { %682 = vmatpush1.bf16.msra.mxu0 %v681_v32  ;;  %702 = vmatpush3.bf16.msra.mxu1 %v699_v56  ;;  %v739_v22 = vpack.c.bf16 %v388_v21, %v387_v20  ;;  %v743_v25 = vpack.c.bf16 %v390_v24, %v389_v23  ;;  %v391_v26 = vld [vmem:[#allocation8 + $0x50] sm:$0xff]  ;;  %v392_v27 = vld [vmem:[#allocation8 + $0x58] sm:$0xff]  ;;  %v393_v29 = vld [vmem:[#allocation8 + $0x60] sm:$0xff]  ;;  %v127_v32 = vlaneseq }
  0x5f   :  { %684 = vmatprep.subr.bf16.mxu0 %v683_v33  ;;  %704 = vmatprep.subr.bf16.mxu1 %v703_v59  ;;  %v747_v28 = vpack.c.bf16 %v392_v27, %v391_v26  ;;  %v394_v30 = vld [vmem:[#allocation8 + $0x68] sm:$0xff]  ;;  %v125_v35 = vld [vmem:[%s1075_s2] sm:$0x3]  ;;  %v396_v27 = vld [vmem:[#allocation8 + $0x78] sm:$0xff] }
  0x60   :  { %v751_v31 = vpack.c.bf16 %v394_v30, %v393_v29  ;;  %v128_v33 = vshrl.u32 %v127_v32, 7  ;;  %v228_v56 = vld [vmem:[%s1076_s3] sm:$0x7] }
  0x61   :  { %v395_v26 = vld [vmem:[#allocation8 + $0x70] sm:$0xff] }
  0x62   :  { %686 = vmatpush1.bf16.msra.mxu0 %v685_v38  ;;  %706 = vmatpush3.bf16.msra.mxu1 %v703_v59  ;;  %v133_v34 = vsub.s32 1, %v128_v33  ;;  %v242_v57 = vadd.s32 4294967295, %v128_v33  ;;  %v263_v58 = vadd.s32 1, %v128_v33  ;;  %v273_v61 = vsub.s32 2, %v128_v33  ;;  %v553_v29 = vld [vmem:[%s1078_s5] ss:$0 sm:$0xff] }
  0x63   :  { %688 = vmatprep.subr.bf16.mxu0 %v687_v39  ;;  %708 = vmatprep.subr.bf16.mxu1 %v707_v62  ;;  %vm239_vm0 = vcmp.lt.s32.totalorder %v128_v33, 1  ;;  %vm260_vm2 = vcmp.lt.s32.totalorder %v128_v33, 7 }
  0x64   :  { %v134_v36 = vrot.slane %v125_v35, %v133_v34  ;;  %vm243_vm1 = vcmp.ge.s32.totalorder %v242_v57, 0  ;;  %vm265_vm3 = vcmp.lt.s32.totalorder %v263_v58, 8 }
  0x66   :  { %690 = vmatpush1.bf16.msra.mxu0 %v689_v44  ;;  %710 = vmatpush3.bf16.msra.mxu1 %v707_v62 }
  0x67   :  { %692 = vmatprep.subr.bf16.mxu0 %v691_v45 }
  0x6a   :  { %694 = vmatpush1.bf16.msra.mxu0 %v693_v48  ;;  %v129_v48 = vsub.s32 0, %v128_v33 }
  0x6b   :  { %728 = vmatprep.subr.bf16.mxu0 %v727_v14 }
  0x6c   :  { %v130_v52 = vrot.slane %v125_v35, %v129_v48  ;;  %v253_v62 = vrot.slane %v228_v56, %v129_v48 }
  0x6d   :  { %202 = vmatmul.mubr.f32.vlgmr.msra.gmra.mrb[0].mxu0 %v1029_v49 }
  0x6e   :  { %207 = vmatprep.mubr.f32.mxu0 %v907_v0  ;;  %v290_v0 = vld [vmem:[#allocation7 + $0x48] sm:$0xff]  ;;  %730 = vmatpush3.bf16.msra.mxu0 %v727_v14 }
  0x6f   :  { %v711_v1 = vpack.c.bf16 %v290_v0, %v289_v63  ;;  %732 = vmatprep.subr.bf16.mxu0 %v731_v16  ;;  %v234_v63 = vrot.slane %v228_v56, %v133_v34 }
  0x71   :  { %208 = vmatmul.mubr.f32.gmra.mrb[2].mxu0 %v1033_v50  ;;  %712 = vmatprep.subr.bf16.mxu1 %v711_v1 }
  0x72   :  { %714 = vmatpush3.bf16.msra.mxu1 %v711_v1  ;;  %734 = vmatpush3.bf16.msra.mxu0 %v731_v16 }
  0x73   :  { %716 = vmatprep.subr.bf16.mxu1 %v715_v5  ;;  %736 = vmatprep.subr.bf16.mxu0 %v735_v19 }
  0x76   :  { %718 = vmatpush3.bf16.msra.mxu1 %v715_v5  ;;  %738 = vmatpush3.bf16.msra.mxu0 %v735_v19  ;;  %v274_v5 = vrot.slane %v228_v56, %v273_v61  ;;  %v555_v61 = vld [vmem:[%s1081_s8] ss:$0 sm:$0xff] }
  0x77   :  { %720 = vmatprep.subr.bf16.mxu1 %v719_v7  ;;  %740 = vmatprep.subr.bf16.mxu0 %v739_v22 }
  0x7a   :  { %722 = vmatpush3.bf16.msra.mxu1 %v719_v7  ;;  %742 = vmatpush3.bf16.msra.mxu0 %v739_v22 }
  0x7b   :  { %724 = vmatprep.subr.bf16.mxu1 %v723_v10  ;;  %744 = vmatprep.subr.bf16.mxu0 %v743_v25 }
  0x7e   :  { %726 = vmatpush3.bf16.msra.mxu1 %v723_v10  ;;  %746 = vmatpush3.bf16.msra.mxu0 %v743_v25 }
  0x7f   :  { %748 = vmatprep.subr.bf16.mxu0 %v747_v28 }
  0x82   :  { %750 = vmatpush3.bf16.msra.mxu0 %v747_v28  ;;  %v755_v28 = vpack.c.bf16 %v396_v27, %v395_v26 }
  0x83   :  { %752 = vmatprep.subr.bf16.mxu0 %v751_v31 }
  0x86   :  { %754 = vmatpush3.bf16.msra.mxu0 %v751_v31 }
  0x87   :  { %756 = vmatprep.subr.bf16.mxu0 %v755_v28 }
  0x8a   :  { %758 = vmatpush3.bf16.msra.mxu0 %v755_v28 }
 0x140   :  { %v203_v37 = vpop.f32.mrb[0].mxu0 }
 0x141   :  { %v205_v38 = vpop.f32.mrb[1].mxu0  ;;  %v204_v53 = vadd.f32 %v203_v37, %v130_v52  ;;  %v554_v37 = vld [vmem:[%s1080_s7] ss:$0 sm:$0xff] }
 0x142   :  { %v206_v39 = vadd.f32 %v205_v38, %v134_v36 }
 0x144   :  { %v551_v40 = vmul.f32 -1.442695, %v206_v39  ;;  %v209_v41 = vpop.f32.mrb[2].mxu0 }
 0x145   :  { %v211_v42 = vpop.f32.mrb[3].mxu0  ;;  %v210_v59 = vadd.f32 %v209_v41, %v130_v52 }
 0x146   :  { %769 = vpow2.f32 %v551_v40  ;;  %v212_v43 = vadd.f32 %v211_v42, %v134_v36  ;;  %v492_v42 = vand.u32 127, %v127_v32 }
 0x148   :  { %v552_v44 = vmul.f32 -1.442695, %v212_v43  ;;  %vm493_vm4 = vcmp.lt.s32.totalorder %v492_v42, 32 }
 0x14a   :  { %771 = vpow2.f32 %v552_v44 }
 0x150   :  { %v770_v45 = vpop.eup %769 }
 0x151   :  { %v220_v46 = vadd.f32 1.0, %v770_v45 }
 0x153   :  { %773 = vrcp.f32 %v220_v46 }
 0x154   :  { %v772_v47 = vpop.eup %771 }
 0x155   :  { %v221_v51 = vadd.f32 1.0, %v772_v47 }
 0x157   :  { %775 = vrcp.f32 %v221_v51 }
 0x15d   :  { %v774_v54 = vpop.eup %773 }
 0x15e   :  { %v226_v55 = vmul.f32 %v774_v54, %v204_v53 }
 0x160   :  { %v237_v1 = vrot.slane %v226_v55, 7  ;;  %v258_v3 = vrot.slane %v226_v55, 1  ;;  %v235_v14 = vmul.f32 %v234_v63, %v226_v55 }
 0x161   :  { %v776_v60 = vpop.eup %775 }
 0x162   :  { %v227_v0 = vmul.f32 %v776_v60, %v210_v59 }
 0x164   :  { %v238_v2 = vrot.slane %v227_v0, 7  ;;  %v259_v4 = vrot.slane %v227_v0, 1  ;;  %v236_v16 = vmul.f32 %v234_v63, %v227_v0  ;;  %v556_v63 = vld [vmem:[%s1082_s9] ss:$0 sm:$0xff] }
 0x166   :  { %v240_v6 = vsel %vm239_vm0, %v237_v1, %v238_v2  ;;  %v241_v7 = vsel %vm239_vm0, %v238_v2, %v237_v1  ;;  %v261_v8 = vsel %vm260_vm2, %v258_v3, %v259_v4  ;;  %v262_v9 = vsel %vm260_vm2, %v259_v4, %v258_v3 }
 0x167   :  { %v248_v10 = vsel %vm243_vm1, %v241_v7, 0.0  ;;  %v249_v11 = vsel %vm243_vm1, %v240_v6, 0.0  ;;  %v269_v12 = vsel %vm265_vm3, %v261_v8, 0.0  ;;  %v270_v13 = vsel %vm265_vm3, %v262_v9, 0.0 }
 0x168   :  { %v254_v15 = vmul.f32 %v253_v62, %v248_v10  ;;  %v255_v17 = vmul.f32 %v253_v62, %v249_v11  ;;  %v275_v19 = vmul.f32 %v274_v5, %v269_v12  ;;  %v276_v21 = vmul.f32 %v274_v5, %v270_v13 }
 0x16a   :  { %v256_v18 = vadd.f32 %v254_v15, %v235_v14  ;;  %v257_v20 = vadd.f32 %v255_v17, %v236_v16 }
 0x16c   :  { %v277_v22 = vadd.f32 %v275_v19, %v256_v18  ;;  %v278_v23 = vadd.f32 %v276_v21, %v257_v20 }
 0x16e   :  { %v279_v24 = vadd.f32 %v277_v22, %v1029_v49  ;;  %v280_v25 = vadd.f32 %v278_v23, %v1033_v50 }
 0x170   :  { %625 = vmatprep.mubr.f32.mxu1 %v279_v24 }
 0x171   :  { %626 = vmatmul.mubr.f32.vlgmr.msra.gmra.mrb[0].mxu1 %v280_v25 }
 0x244   :  { %v627_v30 = vpop.f32.mrb[0].mxu1 }
 0x245   :  { %v376_v31 = vadd.f32 %v627_v30, %v553_v29  ;;  %v370_v33 = vpop.f32.mrb[1].mxu1 }
 0x246   :  { %v371_v34 = vadd.f32 %v553_v29, %v370_v33 }
 0x247   :  { %v380_v36 = vmax.f32 %v376_v31, 0.0 }
 0x248   :  { %v379_v35 = vmax.f32 %v371_v34, 0.0 }
 0x24a   :  { %660 = vmatprep.mubr.f32.mxu0 %v379_v35 }
 0x24b   :  { %661 = vmatmul.mubr.f32.vlgmr.msra.gmra.mrb[4].mxu0 %v380_v36 }
 0x31e   :  { %v662_v49 = vpop.f32.mrb[4].mxu0 }
 0x31f   :  { %v463_v50 = vpop.f32.mrb[5].mxu0  ;;  %v473_v39 = vadd.f32 %v662_v49, %v280_v25 }
 0x320   :  { %v472_v38 = vadd.f32 %v463_v50, %v279_v24 }
 0x321   :  { %v482_v41 = vadd.f32 %v554_v37, %v473_v39 }
 0x322   :  { %v481_v40 = vadd.f32 %v554_v37, %v472_v38 }
 0x324   :  { %483 = vadd.xlane.f32.xlu0 %v481_v40 }
 0x328   :  { %485 = vadd.xlane.f32.xlu0 %v482_v41 }
 0x3b1   :  { %v484_v43 = vpop.xlane.xlu0 %483 }
 0x3b2   :  { %v487_v44 = vmul.f32 0.03125, %v484_v43 }
 0x3b4   :  { %v489_v45 = vsub.f32 %v481_v40, %v487_v44 }
 0x3b5   :  { %v486_v46 = vpop.xlane.xlu0 %485 }
 0x3b6   :  { %v488_v47 = vmul.f32 0.03125, %v486_v46  ;;  %v496_v48 = vsel %vm493_vm4, %v489_v45, 0.0 }
 0x3b7   :  { %v498_v51 = vmul.f32 %v496_v48, %v496_v48 }
 0x3b8   :  { %v490_v52 = vsub.f32 %v482_v41, %v488_v47 }
 0x3b9   :  { %500 = vadd.xlane.f32.xlu1 %v498_v51 }
 0x3ba   :  { %v497_v53 = vsel %vm493_vm4, %v490_v52, 0.0 }
 0x3bb   :  { %v499_v54 = vmul.f32 %v497_v53, %v497_v53 }
 0x3bd   :  { %502 = vadd.xlane.f32.xlu1 %v499_v54 }
 0x446   :  { %v501_v55 = vpop.xlane.xlu1 %500 }
 0x447   :  { %v504_v56 = vmul.f32 0.03125, %v501_v55 }
 0x449   :  { %v506_v57 = vadd.f32 1e-05, %v504_v56 }
 0x44a   :  { %v503_v58 = vpop.xlane.xlu1 %502 }
 0x44b   :  { %777 = vrsqrt.f32 %v506_v57  ;;  %v505_v59 = vmul.f32 0.03125, %v503_v58 }
 0x44d   :  { %v507_v32 = vadd.f32 1e-05, %v505_v59 }
 0x44f   :  { %779 = vrsqrt.f32 %v507_v32 }
 0x455   :  { %v778_v60 = vpop.eup %777 }
 0x456   :  { %v510_v62 = vmul.f32 %v778_v60, %v489_v45 }
 0x458   :  { %v519_v0 = vmul.f32 %v555_v61, %v510_v62 }
 0x459   :  { %v780_v1 = vpop.eup %779 }
 0x45a   :  { %v511_v2 = vmul.f32 %v780_v1, %v490_v52  ;;  %v528_v3 = vadd.f32 %v556_v63, %v519_v0 }
 0x45c   :  { %v520_v4 = vmul.f32 %v555_v61, %v511_v2  ;;  %530 = vst [vmem:[#allocation10] sm:$0xff] %v528_v3 }
 0x45e   :  { %v529_v5 = vadd.f32 %v556_v63, %v520_v4 }
 0x460   :  { %531 = vst [vmem:[#allocation10 + $0x8] sm:$0xff] %v529_v5 }
 0x461   :  { %880 = shalt.err (!%p877_p8)
}
 0x462   :  { %s881_s12 = scalar_lea.hbm %s1083_s10, 256 }
 0x463   :  { %p882_p9 = scmp.ne.s32.totalorder %s1083_s10, %s881_s12  ;;  %p885_p10 = scmp.lt.u32.totalorder %s881_s12, %s1083_s10 }
 0x465   :  { %p887_p11 = pnand %p885_p10, %p882_p9 }
 0x467   :  { %890 = shalt.err (!%p887_p11)
}
 0x468   :  { %543 = dma.vmem_to_hbm [thread:$0]  %s538_s0, 256, %s1083_s10, [#allocation4], %s903_s1, %s903_s1, %s904_s14  }
 0x469   :  { %897 = dma.done.wait [#allocation4], 256  }
 0x46a   :  { %898 = vsyncadd [#allocation4], 4294967040 }
 0x46b   :  { %547 = vsyncpa [#allocation3], 1 }
 0x46c   :  { %548 = vsyncpa [#allocation6], 1 }
 0x46d   :  { %549 = vsyncpa [#allocation9], 1 }
 0x46e   :  { %550 = vsyncpa [#allocation4], 1 }

</bundles_post_ra>
